<compile_context>
chip_gen: v7x
topology: tpu7x:2x2x1
jax: 0.10.0
libtpu: 0.0.40
codegen_flags: <defaults>
</compile_context>

<pallas_src>
import functools

import jax
import jax.numpy as jnp
from jax.experimental import pallas as pl
from jax.experimental.pallas import tpu as pltpu


def _round_up(x, m):
    return (x + m - 1) // m * m


# ----------------------------------------------------------------------------
# Fused Pallas kernel: conv3x3+BN+ReLU -> channel concat -> conv3x3+BN+ReLU
# ----------------------------------------------------------------------------
def _upconv_kernel(x_ref, skip_ref, mask_ref, w1_ref, t1_ref, w2_ref, t2_ref,
                   o_ref, p1_ref, p2_ref, *, W):
    """All activations are (C_p, N*M) with the flattened batch*spatial axis on lanes."""
    NM = x_ref.shape[-1]

    def im2col_bf16(x2d, patches_ref):
        # Write the 9 shifted/masked taps of a 3x3 / pad=1 conv straight into the bf16
        # VMEM scratch slab `patches_ref` (tap-major, channel-minor rows).
        C = x2d.shape[0]
        t = 0       # tap index (kh*3 + kw)
        mrow = 0    # border-mask row (center tap has no mask)
        for dh in (-1, 0, 1):
            for dw in (-1, 0, 1):
                off = dh * W + dw  # flattened-index offset of this tap
                if off == 0:
                    tap = x2d                                   # centre tap: always valid
                else:
                    # shifted[g] = x2d[(g + off) mod NM]; the border mask restores the
                    # zero padding AND kills cross-image wraparound (batch is on lanes).
                    shifted = pltpu.roll(x2d, shift=(-off) % NM, axis=1)
                    tap = shifted * mask_ref[mrow:mrow + 1, :]
                    mrow += 1
                patches_ref[t * C:(t + 1) * C, :] = tap.astype(jnp.bfloat16)
                t += 1

    def conv3x3_bn_relu(x2d, patches_ref, w_ref, t_ref):
        im2col_bf16(x2d, patches_ref)
        # Single MXU matmul: (Cout_p, 9*C_p) @ (9*C_p, NM), f32 accumulation.
        y = jnp.dot(w_ref[...], patches_ref[...],
                    preferred_element_type=jnp.float32)
        # Folded conv-bias + BN (scale already folded into the weights): shift + ReLU, f32.
        return jnp.maximum(y + t_ref[...], 0.0)

    y1 = conv3x3_bn_relu(x_ref[...], p1_ref, w1_ref, t1_ref)     # self.up_conv(x)
    cat = jnp.concatenate([skip_ref[...], y1], axis=0)           # torch.cat([skip, x], 1)
    y2 = conv3x3_bn_relu(cat, p2_ref, w2_ref, t2_ref)            # self.ConvBlock(cat)
    o_ref[...] = y2.astype(o_ref.dtype)


# ----------------------------------------------------------------------------
# Host-side preparation: BN fold, im2col weight flatten, padding, border masks
# ----------------------------------------------------------------------------
def _fold_conv_bn(w, b, bn, cout_p, cin_p, eps=1e-5):
    """Fold Conv2d bias + eval-mode BN into (w_mat[bf16], shift[f32]), channel-padded.

    The BN scale is folded into the weights IN F32 before the bf16 cast; the remaining
    per-channel shift is returned separately for the f32 epilogue.
    """
    gamma, beta, mean, var = bn
    cout, cin = w.shape[0], w.shape[1]
    scale = gamma / jnp.sqrt(var + eps)                      # (Cout,)
    shift = beta + (b - mean) * scale                        # (Cout,)
    w_scaled = w * scale[:, None, None, None]                # exact f32 fold
    w_p = jnp.zeros((cout_p, cin_p, 3, 3), jnp.float32).at[:cout, :cin].set(w_scaled)
    t_p = jnp.zeros((cout_p, 1), jnp.float32).at[:cout, 0].set(shift)
    # (Cout, Cin, kh, kw) -> (Cout, kh, kw, Cin) -> (Cout, 9*Cin): tap-major/channel-minor,
    # matching the order in which the kernel stacks its shifted taps.
    w_mat = jnp.transpose(w_p, (0, 2, 3, 1)).reshape(cout_p, 9 * cin_p).astype(jnp.bfloat16)
    return w_mat, t_p


def _expand_conv2_in_channels(w2, cskip, cskip_p, csec_p):
    """Re-lay ConvBlock's input channels to the padded concat layout [skip_p | y1_p]."""
    co = w2.shape[0]
    cout = w2.shape[1] - cskip
    w2e = jnp.zeros((co, csec_p, 3, 3), jnp.float32)
    w2e = w2e.at[:, :cskip].set(w2[:, :cskip])
    w2e = w2e.at[:, cskip_p:cskip_p + cout].set(w2[:, cskip:])
    return w2e


def _build_border_masks(H, W, N):
    """(8, N*M) f32 validity masks for the 8 non-center taps, image-periodic over lanes."""
    M = H * W
    pos = jnp.arange(M, dtype=jnp.int32)
    hh = pos // W
    ww = pos % W
    rows = []
    for dh in (-1, 0, 1):
        for dw in (-1, 0, 1):
            if dh == 0 and dw == 0:
                continue
            valid = ((hh + dh >= 0) & (hh + dh < H) &
                     (ww + dw >= 0) & (ww + dw < W))
            rows.append(valid.astype(jnp.float32))
    m = jnp.stack(rows, axis=0)            # (8, M)
    return jnp.tile(m, (1, N))             # (8, N*M)


# ----------------------------------------------------------------------------
# UPConv.forward
# ----------------------------------------------------------------------------
def upconv_forward(params, x, skip):
    """x: (N, Cin, H, W), skip: (N, Cskip, H, W) -> (N, Cout, H, W).  All NCHW f32."""
    N, Cin, H, W = x.shape
    Cskip = skip.shape[1]
    M = H * W
    NM = N * M

    w1, b1 = params["conv1"]
    w2, b2 = params["conv2"]
    Cout = w1.shape[0]
    assert w2.shape[1] == Cskip + Cout, "cat([skip, up_conv(x)]) must match ConvBlock input"

    # Channels padded to 16 so every bf16 patch-scratch store is sublane-tile aligned.
    Cin_p = _round_up(Cin, 16)
    Cskip_p = _round_up(Cskip, 16)
    Cout_p = _round_up(Cout, 16)
    Csec_p = Cskip_p + Cout_p

    w1m, t1 = _fold_conv_bn(w1, b1, params["bn1"], Cout_p, Cin_p)
    w2e = _expand_conv2_in_channels(w2, Cskip, Cskip_p, Csec_p)
    w2m, t2 = _fold_conv_bn(w2e, b2, params["bn2"], Cout_p, Csec_p)

    # Collapse the batch into the lane axis: (N, C, H*W) -> (C_p, N*H*W).
    def to_lanes(a, c, c_p):
        a = a.reshape(N, c, M)
        a = jnp.pad(a, ((0, 0), (0, c_p - c), (0, 0)))
        return jnp.transpose(a, (1, 0, 2)).reshape(c_p, NM)

    xf = to_lanes(x, Cin, Cin_p)
    sf = to_lanes(skip, Cskip, Cskip_p)
    masks = _build_border_masks(H, W, N)

    kernel = functools.partial(_upconv_kernel, W=W)
    out = pl.pallas_call(
        kernel,
        out_shape=jax.ShapeDtypeStruct((Cout_p, NM), jnp.float32),
        grid=(1,),
        in_specs=[
            pl.BlockSpec((Cin_p, NM), lambda i: (0, 0)),         # x,     (C_p, N*M)
            pl.BlockSpec((Cskip_p, NM), lambda i: (0, 0)),       # skip
            pl.BlockSpec((8, NM), lambda i: (0, 0)),             # border masks
            pl.BlockSpec((Cout_p, 9 * Cin_p), lambda i: (0, 0)),  # w1 (BN scale folded)
            pl.BlockSpec((Cout_p, 1), lambda i: (0, 0)),          # shift1
            pl.BlockSpec((Cout_p, 9 * Csec_p), lambda i: (0, 0)),  # w2 (BN scale folded)
            pl.BlockSpec((Cout_p, 1), lambda i: (0, 0)),           # shift2
        ],
        out_specs=pl.BlockSpec((Cout_p, NM), lambda i: (0, 0)),
        scratch_shapes=[
            pltpu.VMEM((9 * Cin_p, NM), jnp.bfloat16),   # im2col patches, conv1
            pltpu.VMEM((9 * Csec_p, NM), jnp.bfloat16),  # im2col patches, conv2
        ],
        compiler_params=pltpu.CompilerParams(dimension_semantics=("arbitrary",)),
    )(xf, sf, masks, w1m, t1, w2m, t2)

    # Drop channel padding and restore NCHW.
    out = out.reshape(Cout_p, N, M)[:Cout]
    return jnp.transpose(out, (1, 0, 2)).reshape(N, Cout, H, W)


# ----------------------------------------------------------------------------
# Pure-JAX reference (eval-mode BN), for a tolerance check against the kernel
# ----------------------------------------------------------------------------
def _reference_forward(params, x, skip, eps=1e-5):
    def conv_bn_relu(z, w, b, bn):
        gamma, beta, mean, var = bn
        y = jax.lax.conv_general_dilated(
            z, w, window_strides=(1, 1), padding=((1, 1), (1, 1)),
            dimension_numbers=("NCHW", "OIHW", "NCHW"))
        y = y + b[None, :, None, None]
        y = (y - mean[None, :, None, None]) * (
            gamma[None, :, None, None] / jnp.sqrt(var[None, :, None, None] + eps))
        y = y + beta[None, :, None, None]
        return jnp.maximum(y, 0.0)

    w1, b1 = params["conv1"]
    w2, b2 = params["conv2"]
    y = conv_bn_relu(x, w1, b1, params["bn1"])
    y = jnp.concatenate([skip, y], axis=1)
    return conv_bn_relu(y, w2, b2, params["bn2"])


# ----------------------------------------------------------------------------
# Deterministic synthetic parameters (PyTorch layouts: OIHW conv weights)
# ----------------------------------------------------------------------------
def init_params(key, input_channel, output_channel, sec_input_channel=None):
    if sec_input_channel is None:
        sec_input_channel = 2 * output_channel
    ks = jax.random.split(key, 4)

    def conv_init(k, cin, cout):
        kw, kb = jax.random.split(k)
        w = jax.random.normal(kw, (cout, cin, 3, 3), jnp.float32) * 0.1
        b = jax.random.normal(kb, (cout,), jnp.float32) * 0.01
        return w, b

    def bn_init(k, c):
        kg, kb = jax.random.split(k)
        gamma = 1.0 + 0.05 * jax.random.normal(kg, (c,), jnp.float32)
        beta = 0.05 * jax.random.normal(kb, (c,), jnp.float32)
        running_mean = jnp.zeros((c,), jnp.float32)
        running_var = jnp.ones((c,), jnp.float32)
        return gamma, beta, running_mean, running_var

    return {
        "conv1": conv_init(ks[0], input_channel, output_channel),
        "bn1": bn_init(ks[1], output_channel),
        "conv2": conv_init(ks[2], sec_input_channel, output_channel),
        "bn2": bn_init(ks[3], output_channel),
    }


# ----------------------------------------------------------------------------
if __name__ == "__main__":
    key = jax.random.PRNGKey(0)
    k_param, k_x, k_skip = jax.random.split(key, 3)

    N, H, W = 2, 16, 16
    input_channel, output_channel = 4, 8
    sec_input_channel = 2 * output_channel                  # module default
    skip_channels = sec_input_channel - output_channel      # concat must have Csec channels

    params = init_params(k_param, input_channel, output_channel)
    x = jax.random.normal(k_x, (N, input_channel, H, W), jnp.float32)        # NCHW
    skip = jax.random.normal(k_skip, (N, skip_channels, H, W), jnp.float32)  # NCHW

    fwd = jax.jit(upconv_forward)
    out = fwd(params, x, skip)
    jax.block_until_ready(out)

    assert out.shape == (N, output_channel, H, W), out.shape
    assert bool(jnp.all(jnp.isfinite(out)))
    assert bool(jnp.all(out >= 0.0))   # ReLU output range

    # Numerical check vs. pure-JAX reference (bf16 MXU operands -> loose tolerance).
    ref = _reference_forward(params, x, skip)
    max_err = float(jnp.max(jnp.abs(out - ref)))
    assert bool(jnp.allclose(out, ref, atol=5e-2, rtol=5e-2)), max_err

    print("KERNEL_OK")
</pallas_src>

<mosaic_0001>
module attributes {stable_mosaic.version = 11 : i64} {
  func.func @_upconv_kernel(%arg0: i32, %arg1: memref<16x512xf32, #tpu.memory_space<vmem>>, %arg2: memref<16x512xf32, #tpu.memory_space<vmem>>, %arg3: memref<8x512xf32, #tpu.memory_space<vmem>>, %arg4: memref<16x144xbf16, #tpu.memory_space<vmem>>, %arg5: memref<16x1xf32, #tpu.memory_space<vmem>>, %arg6: memref<16x288xbf16, #tpu.memory_space<vmem>>, %arg7: memref<16x1xf32, #tpu.memory_space<vmem>>, %arg8: memref<16x512xf32, #tpu.memory_space<vmem>>, %arg9: memref<144x512xbf16, #tpu.memory_space<vmem>>, %arg10: memref<288x512xbf16, #tpu.memory_space<vmem>>) attributes {dimension_semantics = [#tpu.dimension_semantics<arbitrary>], iteration_bounds = array<i64: 1>, scalar_prefetch = 0 : i64, scratch_operands = 2 : i64, tpu.core_type = #tpu.core_type<tc>, window_params = [{pipeline_mode = #tpu.pipeline_mode<synchronous>, transform_indices = @transform_0, window_bounds = array<i64: 16, 512>}, {pipeline_mode = #tpu.pipeline_mode<synchronous>, transform_indices = @transform_1, window_bounds = array<i64: 16, 512>}, {pipeline_mode = #tpu.pipeline_mode<synchronous>, transform_indices = @transform_2, window_bounds = array<i64: 8, 512>}, {pipeline_mode = #tpu.pipeline_mode<synchronous>, transform_indices = @transform_3, window_bounds = array<i64: 16, 144>}, {pipeline_mode = #tpu.pipeline_mode<synchronous>, transform_indices = @transform_4, window_bounds = array<i64: 16, 1>}, {pipeline_mode = #tpu.pipeline_mode<synchronous>, transform_indices = @transform_5, window_bounds = array<i64: 16, 288>}, {pipeline_mode = #tpu.pipeline_mode<synchronous>, transform_indices = @transform_6, window_bounds = array<i64: 16, 1>}, {pipeline_mode = #tpu.pipeline_mode<synchronous>, transform_indices = @transform_7, window_bounds = array<i64: 16, 512>}]} {
    %c0 = arith.constant 0 : index
    %c0_0 = arith.constant 0 : index
    %0 = vector.load %arg1[%c0, %c0_0] : memref<16x512xf32, #tpu.memory_space<vmem>>, vector<16x512xf32>
    %c17_i32 = arith.constant 17 : i32
    %1 = tpu.dynamic_rotate %0 by %c17_i32 dim 1 : vector<16x512xf32>, i32 -> vector<16x512xf32>
    %c0_1 = arith.constant 0 : index
    %c0_2 = arith.constant 0 : index
    %2 = vector.load %arg3[%c0_1, %c0_2] : memref<8x512xf32, #tpu.memory_space<vmem>>, vector<1x512xf32>
    %3 = vector.broadcast %2 : vector<1x512xf32> to vector<16x512xf32>
    %4 = arith.mulf %1, %3 : vector<16x512xf32>
    %5 = arith.truncf %4 : vector<16x512xf32> to vector<16x512xbf16>
    %c0_3 = arith.constant 0 : index
    %c0_4 = arith.constant 0 : index
    %6 = vector.load %arg9[%c0_3, %c0_4] : memref<144x512xbf16, #tpu.memory_space<vmem>>, vector<16x512xbf16>
    tpu.vector_store %arg9[%c0_3, %c0_4], %5 {strides = array<i32>} : memref<144x512xbf16, #tpu.memory_space<vmem>>, vector<16x512xbf16>,
    %c16_i32 = arith.constant 16 : i32
    %7 = tpu.dynamic_rotate %0 by %c16_i32 dim 1 : vector<16x512xf32>, i32 -> vector<16x512xf32>
    %c1 = arith.constant 1 : index
    %c0_5 = arith.constant 0 : index
    %8 = vector.load %arg3[%c1, %c0_5] : memref<8x512xf32, #tpu.memory_space<vmem>>, vector<1x512xf32>
    %9 = vector.broadcast %8 : vector<1x512xf32> to vector<16x512xf32>
    %10 = arith.mulf %7, %9 : vector<16x512xf32>
    %11 = arith.truncf %10 : vector<16x512xf32> to vector<16x512xbf16>
    %c16 = arith.constant 16 : index
    %c0_6 = arith.constant 0 : index
    %12 = vector.load %arg9[%c16, %c0_6] : memref<144x512xbf16, #tpu.memory_space<vmem>>, vector<16x512xbf16>
    tpu.vector_store %arg9[%c16, %c0_6], %11 {strides = array<i32>} : memref<144x512xbf16, #tpu.memory_space<vmem>>, vector<16x512xbf16>,
    %c15_i32 = arith.constant 15 : i32
    %13 = tpu.dynamic_rotate %0 by %c15_i32 dim 1 : vector<16x512xf32>, i32 -> vector<16x512xf32>
    %c2 = arith.constant 2 : index
    %c0_7 = arith.constant 0 : index
    %14 = vector.load %arg3[%c2, %c0_7] : memref<8x512xf32, #tpu.memory_space<vmem>>, vector<1x512xf32>
    %15 = vector.broadcast %14 : vector<1x512xf32> to vector<16x512xf32>
    %16 = arith.mulf %13, %15 : vector<16x512xf32>
    %17 = arith.truncf %16 : vector<16x512xf32> to vector<16x512xbf16>
    %c32 = arith.constant 32 : index
    %c0_8 = arith.constant 0 : index
    %18 = vector.load %arg9[%c32, %c0_8] : memref<144x512xbf16, #tpu.memory_space<vmem>>, vector<16x512xbf16>
    tpu.vector_store %arg9[%c32, %c0_8], %17 {strides = array<i32>} : memref<144x512xbf16, #tpu.memory_space<vmem>>, vector<16x512xbf16>,
    %c1_i32 = arith.constant 1 : i32
    %19 = tpu.dynamic_rotate %0 by %c1_i32 dim 1 : vector<16x512xf32>, i32 -> vector<16x512xf32>
    %c3 = arith.constant 3 : index
    %c0_9 = arith.constant 0 : index
    %20 = vector.load %arg3[%c3, %c0_9] : memref<8x512xf32, #tpu.memory_space<vmem>>, vector<1x512xf32>
    %21 = vector.broadcast %20 : vector<1x512xf32> to vector<16x512xf32>
    %22 = arith.mulf %19, %21 : vector<16x512xf32>
    %23 = arith.truncf %22 : vector<16x512xf32> to vector<16x512xbf16>
    %c48 = arith.constant 48 : index
    %c0_10 = arith.constant 0 : index
    %24 = vector.load %arg9[%c48, %c0_10] : memref<144x512xbf16, #tpu.memory_space<vmem>>, vector<16x512xbf16>
    tpu.vector_store %arg9[%c48, %c0_10], %23 {strides = array<i32>} : memref<144x512xbf16, #tpu.memory_space<vmem>>, vector<16x512xbf16>,
    %25 = arith.truncf %0 : vector<16x512xf32> to vector<16x512xbf16>
    %c64 = arith.constant 64 : index
    %c0_11 = arith.constant 0 : index
    %26 = vector.load %arg9[%c64, %c0_11] : memref<144x512xbf16, #tpu.memory_space<vmem>>, vector<16x512xbf16>
    tpu.vector_store %arg9[%c64, %c0_11], %25 {strides = array<i32>} : memref<144x512xbf16, #tpu.memory_space<vmem>>, vector<16x512xbf16>,
    %c511_i32 = arith.constant 511 : i32
    %27 = tpu.dynamic_rotate %0 by %c511_i32 dim 1 : vector<16x512xf32>, i32 -> vector<16x512xf32>
    %c4 = arith.constant 4 : index
    %c0_12 = arith.constant 0 : index
    %28 = vector.load %arg3[%c4, %c0_12] : memref<8x512xf32, #tpu.memory_space<vmem>>, vector<1x512xf32>
    %29 = vector.broadcast %28 : vector<1x512xf32> to vector<16x512xf32>
    %30 = arith.mulf %27, %29 : vector<16x512xf32>
    %31 = arith.truncf %30 : vector<16x512xf32> to vector<16x512xbf16>
    %c80 = arith.constant 80 : index
    %c0_13 = arith.constant 0 : index
    %32 = vector.load %arg9[%c80, %c0_13] : memref<144x512xbf16, #tpu.memory_space<vmem>>, vector<16x512xbf16>
    tpu.vector_store %arg9[%c80, %c0_13], %31 {strides = array<i32>} : memref<144x512xbf16, #tpu.memory_space<vmem>>, vector<16x512xbf16>,
    %c497_i32 = arith.constant 497 : i32
    %33 = tpu.dynamic_rotate %0 by %c497_i32 dim 1 : vector<16x512xf32>, i32 -> vector<16x512xf32>
    %c5 = arith.constant 5 : index
    %c0_14 = arith.constant 0 : index
    %34 = vector.load %arg3[%c5, %c0_14] : memref<8x512xf32, #tpu.memory_space<vmem>>, vector<1x512xf32>
    %35 = vector.broadcast %34 : vector<1x512xf32> to vector<16x512xf32>
    %36 = arith.mulf %33, %35 : vector<16x512xf32>
    %37 = arith.truncf %36 : vector<16x512xf32> to vector<16x512xbf16>
    %c96 = arith.constant 96 : index
    %c0_15 = arith.constant 0 : index
    %38 = vector.load %arg9[%c96, %c0_15] : memref<144x512xbf16, #tpu.memory_space<vmem>>, vector<16x512xbf16>
    tpu.vector_store %arg9[%c96, %c0_15], %37 {strides = array<i32>} : memref<144x512xbf16, #tpu.memory_space<vmem>>, vector<16x512xbf16>,
    %c496_i32 = arith.constant 496 : i32
    %39 = tpu.dynamic_rotate %0 by %c496_i32 dim 1 : vector<16x512xf32>, i32 -> vector<16x512xf32>
    %c6 = arith.constant 6 : index
    %c0_16 = arith.constant 0 : index
    %40 = vector.load %arg3[%c6, %c0_16] : memref<8x512xf32, #tpu.memory_space<vmem>>, vector<1x512xf32>
    %41 = vector.broadcast %40 : vector<1x512xf32> to vector<16x512xf32>
    %42 = arith.mulf %39, %41 : vector<16x512xf32>
    %43 = arith.truncf %42 : vector<16x512xf32> to vector<16x512xbf16>
    %c112 = arith.constant 112 : index
    %c0_17 = arith.constant 0 : index
    %44 = vector.load %arg9[%c112, %c0_17] : memref<144x512xbf16, #tpu.memory_space<vmem>>, vector<16x512xbf16>
    tpu.vector_store %arg9[%c112, %c0_17], %43 {strides = array<i32>} : memref<144x512xbf16, #tpu.memory_space<vmem>>, vector<16x512xbf16>,
    %c495_i32 = arith.constant 495 : i32
    %45 = tpu.dynamic_rotate %0 by %c495_i32 dim 1 : vector<16x512xf32>, i32 -> vector<16x512xf32>
    %c7 = arith.constant 7 : index
    %c0_18 = arith.constant 0 : index
    %46 = vector.load %arg3[%c7, %c0_18] : memref<8x512xf32, #tpu.memory_space<vmem>>, vector<1x512xf32>
    %47 = vector.broadcast %46 : vector<1x512xf32> to vector<16x512xf32>
    %48 = arith.mulf %45, %47 : vector<16x512xf32>
    %49 = arith.truncf %48 : vector<16x512xf32> to vector<16x512xbf16>
    %c128 = arith.constant 128 : index
    %c0_19 = arith.constant 0 : index
    %50 = vector.load %arg9[%c128, %c0_19] : memref<144x512xbf16, #tpu.memory_space<vmem>>, vector<16x512xbf16>
    tpu.vector_store %arg9[%c128, %c0_19], %49 {strides = array<i32>} : memref<144x512xbf16, #tpu.memory_space<vmem>>, vector<16x512xbf16>,
    %c0_20 = arith.constant 0 : index
    %c0_21 = arith.constant 0 : index
    %51 = vector.load %arg4[%c0_20, %c0_21] : memref<16x144xbf16, #tpu.memory_space<vmem>>, vector<16x144xbf16>
    %c0_22 = arith.constant 0 : index
    %c0_23 = arith.constant 0 : index
    %52 = vector.load %arg9[%c0_22, %c0_23] : memref<144x512xbf16, #tpu.memory_space<vmem>>, vector<144x512xbf16>
    %cst = arith.constant dense<0.000000e+00> : vector<16x512xf32>
    %53 = tpu.matmul %51, %52, %cst {dimension_numbers = #tpu.dot_dimension_numbers<[1], [0], [0], [1], [0, 0, 1, 1], [], []>} : vector<16x144xbf16>, vector<144x512xbf16>, vector<16x512xf32> -> vector<16x512xf32>
    %c0_24 = arith.constant 0 : index
    %c0_25 = arith.constant 0 : index
    %54 = vector.load %arg5[%c0_24, %c0_25] : memref<16x1xf32, #tpu.memory_space<vmem>>, vector<16x1xf32>
    %55 = vector.broadcast %54 : vector<16x1xf32> to vector<16x512xf32>
    %56 = arith.addf %53, %55 : vector<16x512xf32>
    %cst_26 = arith.constant 0.000000e+00 : f32
    %57 = vector.broadcast %cst_26 : f32 to vector<16x512xf32>
    %58 = arith.maximumf %56, %57 : vector<16x512xf32>
    %c0_27 = arith.constant 0 : index
    %c0_28 = arith.constant 0 : index
    %59 = vector.load %arg2[%c0_27, %c0_28] : memref<16x512xf32, #tpu.memory_space<vmem>>, vector<16x512xf32>
    %60 = tpu.concatenate %59, %58 in 0 : vector<16x512xf32>, vector<16x512xf32> -> vector<32x512xf32>
    %c17_i32_29 = arith.constant 17 : i32
    %61 = tpu.dynamic_rotate %60 by %c17_i32_29 dim 1 : vector<32x512xf32>, i32 -> vector<32x512xf32>
    %c0_30 = arith.constant 0 : index
    %c0_31 = arith.constant 0 : index
    %62 = vector.load %arg3[%c0_30, %c0_31] : memref<8x512xf32, #tpu.memory_space<vmem>>, vector<1x512xf32>
    %63 = vector.broadcast %62 : vector<1x512xf32> to vector<32x512xf32>
    %64 = arith.mulf %61, %63 : vector<32x512xf32>
    %65 = arith.truncf %64 : vector<32x512xf32> to vector<32x512xbf16>
    %c0_32 = arith.constant 0 : index
    %c0_33 = arith.constant 0 : index
    %66 = vector.load %arg10[%c0_32, %c0_33] : memref<288x512xbf16, #tpu.memory_space<vmem>>, vector<32x512xbf16>
    tpu.vector_store %arg10[%c0_32, %c0_33], %65 {strides = array<i32>} : memref<288x512xbf16, #tpu.memory_space<vmem>>, vector<32x512xbf16>,
    %c16_i32_34 = arith.constant 16 : i32
    %67 = tpu.dynamic_rotate %60 by %c16_i32_34 dim 1 : vector<32x512xf32>, i32 -> vector<32x512xf32>
    %c1_35 = arith.constant 1 : index
    %c0_36 = arith.constant 0 : index
    %68 = vector.load %arg3[%c1_35, %c0_36] : memref<8x512xf32, #tpu.memory_space<vmem>>, vector<1x512xf32>
    %69 = vector.broadcast %68 : vector<1x512xf32> to vector<32x512xf32>
    %70 = arith.mulf %67, %69 : vector<32x512xf32>
    %71 = arith.truncf %70 : vector<32x512xf32> to vector<32x512xbf16>
    %c32_37 = arith.constant 32 : index
    %c0_38 = arith.constant 0 : index
    %72 = vector.load %arg10[%c32_37, %c0_38] : memref<288x512xbf16, #tpu.memory_space<vmem>>, vector<32x512xbf16>
    tpu.vector_store %arg10[%c32_37, %c0_38], %71 {strides = array<i32>} : memref<288x512xbf16, #tpu.memory_space<vmem>>, vector<32x512xbf16>,
    %c15_i32_39 = arith.constant 15 : i32
    %73 = tpu.dynamic_rotate %60 by %c15_i32_39 dim 1 : vector<32x512xf32>, i32 -> vector<32x512xf32>
    %c2_40 = arith.constant 2 : index
    %c0_41 = arith.constant 0 : index
    %74 = vector.load %arg3[%c2_40, %c0_41] : memref<8x512xf32, #tpu.memory_space<vmem>>, vector<1x512xf32>
    %75 = vector.broadcast %74 : vector<1x512xf32> to vector<32x512xf32>
    %76 = arith.mulf %73, %75 : vector<32x512xf32>
    %77 = arith.truncf %76 : vector<32x512xf32> to vector<32x512xbf16>
    %c64_42 = arith.constant 64 : index
    %c0_43 = arith.constant 0 : index
    %78 = vector.load %arg10[%c64_42, %c0_43] : memref<288x512xbf16, #tpu.memory_space<vmem>>, vector<32x512xbf16>
    tpu.vector_store %arg10[%c64_42, %c0_43], %77 {strides = array<i32>} : memref<288x512xbf16, #tpu.memory_space<vmem>>, vector<32x512xbf16>,
    %c1_i32_44 = arith.constant 1 : i32
    %79 = tpu.dynamic_rotate %60 by %c1_i32_44 dim 1 : vector<32x512xf32>, i32 -> vector<32x512xf32>
    %c3_45 = arith.constant 3 : index
    %c0_46 = arith.constant 0 : index
    %80 = vector.load %arg3[%c3_45, %c0_46] : memref<8x512xf32, #tpu.memory_space<vmem>>, vector<1x512xf32>
    %81 = vector.broadcast %80 : vector<1x512xf32> to vector<32x512xf32>
    %82 = arith.mulf %79, %81 : vector<32x512xf32>
    %83 = arith.truncf %82 : vector<32x512xf32> to vector<32x512xbf16>
    %c96_47 = arith.constant 96 : index
    %c0_48 = arith.constant 0 : index
    %84 = vector.load %arg10[%c96_47, %c0_48] : memref<288x512xbf16, #tpu.memory_space<vmem>>, vector<32x512xbf16>
    tpu.vector_store %arg10[%c96_47, %c0_48], %83 {strides = array<i32>} : memref<288x512xbf16, #tpu.memory_space<vmem>>, vector<32x512xbf16>,
    %85 = arith.truncf %60 : vector<32x512xf32> to vector<32x512xbf16>
    %c128_49 = arith.constant 128 : index
    %c0_50 = arith.constant 0 : index
    %86 = vector.load %arg10[%c128_49, %c0_50] : memref<288x512xbf16, #tpu.memory_space<vmem>>, vector<32x512xbf16>
    tpu.vector_store %arg10[%c128_49, %c0_50], %85 {strides = array<i32>} : memref<288x512xbf16, #tpu.memory_space<vmem>>, vector<32x512xbf16>,
    %c511_i32_51 = arith.constant 511 : i32
    %87 = tpu.dynamic_rotate %60 by %c511_i32_51 dim 1 : vector<32x512xf32>, i32 -> vector<32x512xf32>
    %c4_52 = arith.constant 4 : index
    %c0_53 = arith.constant 0 : index
    %88 = vector.load %arg3[%c4_52, %c0_53] : memref<8x512xf32, #tpu.memory_space<vmem>>, vector<1x512xf32>
    %89 = vector.broadcast %88 : vector<1x512xf32> to vector<32x512xf32>
    %90 = arith.mulf %87, %89 : vector<32x512xf32>
    %91 = arith.truncf %90 : vector<32x512xf32> to vector<32x512xbf16>
    %c160 = arith.constant 160 : index
    %c0_54 = arith.constant 0 : index
    %92 = vector.load %arg10[%c160, %c0_54] : memref<288x512xbf16, #tpu.memory_space<vmem>>, vector<32x512xbf16>
    tpu.vector_store %arg10[%c160, %c0_54], %91 {strides = array<i32>} : memref<288x512xbf16, #tpu.memory_space<vmem>>, vector<32x512xbf16>,
    %c497_i32_55 = arith.constant 497 : i32
    %93 = tpu.dynamic_rotate %60 by %c497_i32_55 dim 1 : vector<32x512xf32>, i32 -> vector<32x512xf32>
    %c5_56 = arith.constant 5 : index
    %c0_57 = arith.constant 0 : index
    %94 = vector.load %arg3[%c5_56, %c0_57] : memref<8x512xf32, #tpu.memory_space<vmem>>, vector<1x512xf32>
    %95 = vector.broadcast %94 : vector<1x512xf32> to vector<32x512xf32>
    %96 = arith.mulf %93, %95 : vector<32x512xf32>
    %97 = arith.truncf %96 : vector<32x512xf32> to vector<32x512xbf16>
    %c192 = arith.constant 192 : index
    %c0_58 = arith.constant 0 : index
    %98 = vector.load %arg10[%c192, %c0_58] : memref<288x512xbf16, #tpu.memory_space<vmem>>, vector<32x512xbf16>
    tpu.vector_store %arg10[%c192, %c0_58], %97 {strides = array<i32>} : memref<288x512xbf16, #tpu.memory_space<vmem>>, vector<32x512xbf16>,
    %c496_i32_59 = arith.constant 496 : i32
    %99 = tpu.dynamic_rotate %60 by %c496_i32_59 dim 1 : vector<32x512xf32>, i32 -> vector<32x512xf32>
    %c6_60 = arith.constant 6 : index
    %c0_61 = arith.constant 0 : index
    %100 = vector.load %arg3[%c6_60, %c0_61] : memref<8x512xf32, #tpu.memory_space<vmem>>, vector<1x512xf32>
    %101 = vector.broadcast %100 : vector<1x512xf32> to vector<32x512xf32>
    %102 = arith.mulf %99, %101 : vector<32x512xf32>
    %103 = arith.truncf %102 : vector<32x512xf32> to vector<32x512xbf16>
    %c224 = arith.constant 224 : index
    %c0_62 = arith.constant 0 : index
    %104 = vector.load %arg10[%c224, %c0_62] : memref<288x512xbf16, #tpu.memory_space<vmem>>, vector<32x512xbf16>
    tpu.vector_store %arg10[%c224, %c0_62], %103 {strides = array<i32>} : memref<288x512xbf16, #tpu.memory_space<vmem>>, vector<32x512xbf16>,
    %c495_i32_63 = arith.constant 495 : i32
    %105 = tpu.dynamic_rotate %60 by %c495_i32_63 dim 1 : vector<32x512xf32>, i32 -> vector<32x512xf32>
    %c7_64 = arith.constant 7 : index
    %c0_65 = arith.constant 0 : index
    %106 = vector.load %arg3[%c7_64, %c0_65] : memref<8x512xf32, #tpu.memory_space<vmem>>, vector<1x512xf32>
    %107 = vector.broadcast %106 : vector<1x512xf32> to vector<32x512xf32>
    %108 = arith.mulf %105, %107 : vector<32x512xf32>
    %109 = arith.truncf %108 : vector<32x512xf32> to vector<32x512xbf16>
    %c256 = arith.constant 256 : index
    %c0_66 = arith.constant 0 : index
    %110 = vector.load %arg10[%c256, %c0_66] : memref<288x512xbf16, #tpu.memory_space<vmem>>, vector<32x512xbf16>
    tpu.vector_store %arg10[%c256, %c0_66], %109 {strides = array<i32>} : memref<288x512xbf16, #tpu.memory_space<vmem>>, vector<32x512xbf16>,
    %c0_67 = arith.constant 0 : index
    %c0_68 = arith.constant 0 : index
    %111 = vector.load %arg6[%c0_67, %c0_68] : memref<16x288xbf16, #tpu.memory_space<vmem>>, vector<16x288xbf16>
    %c0_69 = arith.constant 0 : index
    %c0_70 = arith.constant 0 : index
    %112 = vector.load %arg10[%c0_69, %c0_70] : memref<288x512xbf16, #tpu.memory_space<vmem>>, vector<288x512xbf16>
    %cst_71 = arith.constant dense<0.000000e+00> : vector<16x512xf32>
    %113 = tpu.matmul %111, %112, %cst_71 {dimension_numbers = #tpu.dot_dimension_numbers<[1], [0], [0], [1], [0, 0, 1, 1], [], []>} : vector<16x288xbf16>, vector<288x512xbf16>, vector<16x512xf32> -> vector<16x512xf32>
    %c0_72 = arith.constant 0 : index
    %c0_73 = arith.constant 0 : index
    %114 = vector.load %arg7[%c0_72, %c0_73] : memref<16x1xf32, #tpu.memory_space<vmem>>, vector<16x1xf32>
    %115 = vector.broadcast %114 : vector<16x1xf32> to vector<16x512xf32>
    %116 = arith.addf %113, %115 : vector<16x512xf32>
    %cst_74 = arith.constant 0.000000e+00 : f32
    %117 = vector.broadcast %cst_74 : f32 to vector<16x512xf32>
    %118 = arith.maximumf %116, %117 : vector<16x512xf32>
    %c0_75 = arith.constant 0 : index
    %c0_76 = arith.constant 0 : index
    %119 = vector.load %arg8[%c0_75, %c0_76] : memref<16x512xf32, #tpu.memory_space<vmem>>, vector<16x512xf32>
    tpu.vector_store %arg8[%c0_75, %c0_76], %118 {strides = array<i32>} : memref<16x512xf32, #tpu.memory_space<vmem>>, vector<16x512xf32>,
    return
  }
  func.func @transform_0(%arg0: i32) -> (i32, i32) {
    %c0_i32 = arith.constant 0 : i32
    %c0_i32_0 = arith.constant 0 : i32
    %c0_i32_1 = arith.constant 0 : i32
    return %c0_i32, %c0_i32_0 : i32, i32
  }
  func.func @transform_1(%arg0: i32) -> (i32, i32) {
    %c0_i32 = arith.constant 0 : i32
    %c0_i32_0 = arith.constant 0 : i32
    %c0_i32_1 = arith.constant 0 : i32
    return %c0_i32, %c0_i32_0 : i32, i32
  }
  func.func @transform_2(%arg0: i32) -> (i32, i32) {
    %c0_i32 = arith.constant 0 : i32
    %c0_i32_0 = arith.constant 0 : i32
    %c0_i32_1 = arith.constant 0 : i32
    return %c0_i32, %c0_i32_0 : i32, i32
  }
  func.func @transform_3(%arg0: i32) -> (i32, i32) {
    %c0_i32 = arith.constant 0 : i32
    %c0_i32_0 = arith.constant 0 : i32
    %c0_i32_1 = arith.constant 0 : i32
    return %c0_i32, %c0_i32_0 : i32, i32
  }
  func.func @transform_4(%arg0: i32) -> (i32, i32) {
    %c0_i32 = arith.constant 0 : i32
    %c0_i32_0 = arith.constant 0 : i32
    %c0_i32_1 = arith.constant 0 : i32
    return %c0_i32, %c0_i32_0 : i32, i32
  }
  func.func @transform_5(%arg0: i32) -> (i32, i32) {
    %c0_i32 = arith.constant 0 : i32
    %c0_i32_0 = arith.constant 0 : i32
    %c0_i32_1 = arith.constant 0 : i32
    return %c0_i32, %c0_i32_0 : i32, i32
  }
  func.func @transform_6(%arg0: i32) -> (i32, i32) {
    %c0_i32 = arith.constant 0 : i32
    %c0_i32_0 = arith.constant 0 : i32
    %c0_i32_1 = arith.constant 0 : i32
    return %c0_i32, %c0_i32_0 : i32, i32
  }
  func.func @transform_7(%arg0: i32) -> (i32, i32) {
    %c0_i32 = arith.constant 0 : i32
    %c0_i32_0 = arith.constant 0 : i32
    %c0_i32_1 = arith.constant 0 : i32
    return %c0_i32, %c0_i32_0 : i32, i32
  }
}

</mosaic_0001>

<bundles_post_ra>
// kernel: upconv_forward.1
= control target key start
LH: loop header
LB: loop body
LE: loop exit
PB: predicated region body
PF: predicated region fallthrough
CT: control target
= control target key end

     0   :  { %s1917_s28 = smov 17   ;;  %s1918_s18 = smov 16   ;;  %v51_v8 = vlaneseq  ;;  %vm615_vm1 = vcmask 130048   ;;  %v3710_v26 = vmov 0   ;;  %vm1656_vm9 = vcmask 261120   ;;  %s3702_s0 = inlined_call_operand.vmem [shape: f32[16,512], index: 0, kind: input, shape index: {}]   ;;  %s3703_s2 = inlined_call_operand.vmem [shape: f32[8,512], index: 2, kind: input, shape index: {}]   ;;  %s3704_s3 = inlined_call_operand.vmem [shape: bf16[16,144], index: 3, kind: input, shape index: {}]   ;;  %s3705_s4 = inlined_call_operand.vmem [shape: f32[16,1], index: 4, kind: input, shape index: {}]   ;;  %s3706_s1 = inlined_call_operand.vmem [shape: f32[16,512], index: 1, kind: input, shape index: {}]   ;;  %s3707_s5 = inlined_call_operand.vmem [shape: bf16[16,288], index: 5, kind: input, shape index: {}]   ;;  %s3708_s6 = inlined_call_operand.vmem [shape: f32[16,1], index: 6, kind: input, shape index: {}]   ;;  %s3709_s7 = inlined_call_operand.vmem [shape: f32[16,512], index: 7, kind: output, shape index: {}]  }
   0x1   :  { %v1969_v0 = vld [vmem:[%s3702_s0 + $0x8] sm:$0xff]  ;;  %v1974_v1 = vld [vmem:[%s3702_s0] sm:$0xff]  ;;  %v1997_v4 = vld [vmem:[%s3702_s0 + $0x30] sm:$0xff]  ;;  %s1920_s19 = smov 1   ;;  %s1921_s20 = smov 127   ;;  %1901 = vset.pattern.permute.xlu1 %v3710_v26  ;;  %1900 = vset.pattern.permute.xlu0 %v3710_v26 }
   0x2   :  { %39 = vrot.lane.b32.xlu1 %v1969_v0, %s1917_s28  ;;  %35 = vrot.lane.b32.xlu0 %v1974_v1, %s1917_s28  ;;  %v1983_v2 = vld [vmem:[%s3702_s0 + $0x28] sm:$0xff]  ;;  %v1988_v3 = vld [vmem:[%s3702_s0 + $0x20] sm:$0xff]  ;;  %s1922_s21 = smov 113   ;;  %s1923_s22 = smov 112   ;;  %v65_v9 = vshrl.u32 %v51_v8, 7  ;;  %v2118_v10 = vand.u32 127, %v51_v8 }
   0x3   :  { %v2002_v5 = vld [vmem:[%s3702_s0 + $0x10] sm:$0xff]  ;;  %v2011_v6 = vld [vmem:[%s3702_s0 + $0x38] sm:$0xff]  ;;  %s1924_s23 = smov 111   ;;  %v1904_v15 = vld [vmem:[%s3704_s3 + $0x4] ss:$8 sps:$4 sm:$0xff]  }
   0x4   :  { %v2016_v7 = vld [vmem:[%s3702_s0 + $0x18] sm:$0xff]  ;;  %s1919_s0 = smov 15   ;;  %v2124_v11 = vsub.s32 1, %v65_v9  ;;  %vm53_vm0 = vcmp.lt.s32.totalorder %v2118_v10, 17  ;;  %1861 = vmatprep.mubr.msk.bf16.mxu0 %vm615_vm1, %v1904_v15  ;;  %1862 = vmatprep.mubr.msk.bf16.mxu1 %vm615_vm1, %v1904_v15  ;;  %v2140_v20 = vsub.s32 2, %v65_v9  ;;  %v2144_v22 = vsub.s32 0, %v65_v9 }
   0x5   :  { %v62_v12 = vld [vmem:[%s3703_s2] ss:$8 sm:$0xf]  ;;  %v2150_v25 = vsub.s32 3, %v65_v9  ;;  %vm116_vm2 = vcmp.lt.s32.totalorder %v2118_v10, 16  ;;  %vm180_vm3 = vcmp.lt.s32.totalorder %v2118_v10, 15 }
   0x6   :  { %41 = vrot.lane.b32.xlu1 %v1983_v2, %s1917_s28  ;;  %37 = vrot.lane.b32.xlu0 %v1988_v3, %s1917_s28  ;;  %v71_v16 = vrot.slane %v62_v12, %v2124_v11  ;;  %v75_v30 = vrot.slane %v62_v12, %v2140_v20  ;;  %v67_v33 = vrot.slane %v62_v12, %v2144_v22  ;;  %v595_v35 = vld [vmem:[%s3705_s4 + $0x8] sm:$0xff]  ;;  %v594_v40 = vld [vmem:[%s3705_s4] sm:$0xff]  ;;  %vm244_vm4 = vcmp.lt.s32.totalorder %v2118_v10, 1 }
   0x7   :  { %v79_v34 = vrot.slane %v62_v12, %v2150_v25  ;;  %v1852_v49 = vld [vmem:[%s3703_s2 + $0x1] ss:$8 sm:$0xf]  ;;  %vm316_vm5 = vcmp.lt.s32.totalorder %v2118_v10, 127  ;;  %vm380_vm6 = vcmp.lt.s32.totalorder %v2118_v10, 113  ;;  %vm444_vm7 = vcmp.lt.s32.totalorder %v2118_v10, 112 }
   0x8   :  { %v2185_v54 = vld [vmem:[%s3706_s1] sm:$0xff]  ;;  %v135_v57 = vrot.slane %v1852_v49, %v2124_v11  ;;  %v2201_v60 = vld [vmem:[%s3706_s1 + $0x8] sm:$0xff]  ;;  %v139_v12 = vrot.slane %v1852_v49, %v2140_v20  ;;  %vm508_vm8 = vcmp.lt.s32.totalorder %v2118_v10, 111 }
   0x9   :  { %v2190_v56 = vld [vmem:[%s3706_s1 + $0x20] sm:$0xff]  ;;  %v2210_v63 = vld [vmem:[%s3706_s1 + $0x28] sm:$0xff] }
   0xa   :  { %45 = vrot.lane.b32.xlu1 %v1997_v4, %s1917_s28  ;;  %43 = vrot.lane.b32.xlu0 %v2002_v5, %s1917_s28 }
   0xe   :  { %49 = vrot.lane.b32.xlu1 %v2011_v6, %s1917_s28  ;;  %47 = vrot.lane.b32.xlu0 %v2016_v7, %s1917_s28 }
  0x12   :  { %102 = vrot.lane.b32.xlu1 %v1988_v3, %s1918_s18  ;;  %100 = vrot.lane.b32.xlu0 %v1974_v1, %s1918_s18 }
  0x16   :  { %106 = vrot.lane.b32.xlu1 %v1983_v2, %s1918_s18  ;;  %104 = vrot.lane.b32.xlu0 %v1969_v0, %s1918_s18 }
  0x1a   :  { %110 = vrot.lane.b32.xlu1 %v1997_v4, %s1918_s18  ;;  %108 = vrot.lane.b32.xlu0 %v2002_v5, %s1918_s18 }
  0x1e   :  { %114 = vrot.lane.b32.xlu1 %v2011_v6, %s1918_s18  ;;  %112 = vrot.lane.b32.xlu0 %v2016_v7, %s1918_s18 }
  0x22   :  { %166 = vrot.lane.b32.xlu1 %v1988_v3, %s1919_s0  ;;  %164 = vrot.lane.b32.xlu0 %v1974_v1, %s1919_s0 }
  0x26   :  { %170 = vrot.lane.b32.xlu1 %v1983_v2, %s1919_s0  ;;  %168 = vrot.lane.b32.xlu0 %v1969_v0, %s1919_s0 }
  0x2a   :  { %174 = vrot.lane.b32.xlu1 %v1997_v4, %s1919_s0  ;;  %172 = vrot.lane.b32.xlu0 %v2002_v5, %s1919_s0 }
  0x2e   :  { %178 = vrot.lane.b32.xlu1 %v2011_v6, %s1919_s0  ;;  %176 = vrot.lane.b32.xlu0 %v2016_v7, %s1919_s0 }
  0x32   :  { %230 = vrot.lane.b32.xlu1 %v1988_v3, %s1920_s19  ;;  %228 = vrot.lane.b32.xlu0 %v1974_v1, %s1920_s19 }
  0x36   :  { %234 = vrot.lane.b32.xlu1 %v1983_v2, %s1920_s19  ;;  %232 = vrot.lane.b32.xlu0 %v1969_v0, %s1920_s19 }
  0x3a   :  { %238 = vrot.lane.b32.xlu1 %v1997_v4, %s1920_s19  ;;  %236 = vrot.lane.b32.xlu0 %v2002_v5, %s1920_s19 }
  0x3e   :  { %242 = vrot.lane.b32.xlu1 %v2011_v6, %s1920_s19  ;;  %240 = vrot.lane.b32.xlu0 %v2016_v7, %s1920_s19 }
  0x42   :  { %302 = vrot.lane.b32.xlu1 %v1988_v3, %s1921_s20  ;;  %300 = vrot.lane.b32.xlu0 %v1974_v1, %s1921_s20 }
  0x46   :  { %306 = vrot.lane.b32.xlu1 %v1983_v2, %s1921_s20  ;;  %304 = vrot.lane.b32.xlu0 %v1969_v0, %s1921_s20 }
  0x4a   :  { %310 = vrot.lane.b32.xlu1 %v1997_v4, %s1921_s20  ;;  %308 = vrot.lane.b32.xlu0 %v2002_v5, %s1921_s20 }
  0x4e   :  { %314 = vrot.lane.b32.xlu1 %v2011_v6, %s1921_s20  ;;  %312 = vrot.lane.b32.xlu0 %v2016_v7, %s1921_s20 }
  0x52   :  { %366 = vrot.lane.b32.xlu1 %v1988_v3, %s1922_s21  ;;  %364 = vrot.lane.b32.xlu0 %v1974_v1, %s1922_s21 }
  0x56   :  { %370 = vrot.lane.b32.xlu1 %v1983_v2, %s1922_s21  ;;  %368 = vrot.lane.b32.xlu0 %v1969_v0, %s1922_s21 }
  0x5a   :  { %374 = vrot.lane.b32.xlu1 %v1997_v4, %s1922_s21  ;;  %372 = vrot.lane.b32.xlu0 %v2002_v5, %s1922_s21 }
  0x5e   :  { %378 = vrot.lane.b32.xlu1 %v2011_v6, %s1922_s21  ;;  %376 = vrot.lane.b32.xlu0 %v2016_v7, %s1922_s21 }
  0x62   :  { %430 = vrot.lane.b32.xlu1 %v1988_v3, %s1923_s22  ;;  %428 = vrot.lane.b32.xlu0 %v1974_v1, %s1923_s22 }
  0x66   :  { %434 = vrot.lane.b32.xlu1 %v1983_v2, %s1923_s22  ;;  %432 = vrot.lane.b32.xlu0 %v1969_v0, %s1923_s22 }
  0x6a   :  { %438 = vrot.lane.b32.xlu1 %v1997_v4, %s1923_s22  ;;  %436 = vrot.lane.b32.xlu0 %v2002_v5, %s1923_s22 }
  0x6e   :  { %442 = vrot.lane.b32.xlu1 %v2011_v6, %s1923_s22  ;;  %440 = vrot.lane.b32.xlu0 %v2016_v7, %s1923_s22 }
  0x72   :  { %494 = vrot.lane.b32.xlu1 %v1988_v3, %s1924_s23  ;;  %492 = vrot.lane.b32.xlu0 %v1974_v1, %s1924_s23 }
  0x74   :  { %v40_v13 = vpop.permute.xlu1 %39  ;;  %v36_v14 = vpop.permute.xlu0 %35 }
  0x75   :  { %v58_v17 = vsel %vm53_vm0, %v36_v14, %v40_v13 }
  0x76   :  { %498 = vrot.lane.b32.xlu1 %v1983_v2, %s1924_s23  ;;  %496 = vrot.lane.b32.xlu0 %v1969_v0, %s1924_s23  ;;  %v85_v23 = vmul.f32 %v71_v16, %v58_v17 }
  0x78   :  { %v42_v18 = vpop.permute.xlu1 %41  ;;  %v38_v19 = vpop.permute.xlu0 %37 }
  0x79   :  { %v59_v21 = vsel %vm53_vm0, %v38_v19, %v42_v18 }
  0x7a   :  { %502 = vrot.lane.b32.xlu1 %v1997_v4, %s1924_s23  ;;  %500 = vrot.lane.b32.xlu0 %v2002_v5, %s1924_s23  ;;  %v89_v24 = vmul.f32 %v71_v16, %v59_v21  ;;  %v2220_v16 = vld [vmem:[%s3706_s1 + $0x10] sm:$0xff]  ;;  %v131_v21 = vrot.slane %v1852_v49, %v2144_v22 }
  0x7c   :  { %v46_v27 = vpop.permute.xlu1 %45  ;;  %v44_v28 = vpop.permute.xlu0 %43  ;;  %v93_v29 = vpack.c.bf16 %v89_v24, %v85_v23  ;;  %v143_v23 = vrot.slane %v1852_v49, %v2150_v25 }
  0x7d   :  { %v57_v31 = vsel %vm53_vm0, %v42_v18, %v46_v27  ;;  %v56_v32 = vsel %vm53_vm0, %v40_v13, %v44_v28 }
  0x7e   :  { %506 = vrot.lane.b32.xlu1 %v2011_v6, %s1924_s23  ;;  %504 = vrot.lane.b32.xlu0 %v2016_v7, %s1924_s23  ;;  %v86_v38 = vmul.f32 %v75_v30, %v56_v32  ;;  %v90_v39 = vmul.f32 %v75_v30, %v57_v31  ;;  %v2240_v30 = vld [vmem:[%s3706_s1 + $0x18] sm:$0xff] }
  0x7f   :  { %619 = vmatprep.subr.bf16.mxu0 %v93_v29 }
  0x80   :  { %v50_v36 = vpop.permute.xlu1 %49  ;;  %v48_v37 = vpop.permute.xlu0 %47  ;;  %v94_v55 = vpack.c.bf16 %v90_v39, %v86_v38 }
  0x81   :  { %v61_v41 = vsel %vm53_vm0, %v50_v36, %v38_v19  ;;  %v60_v42 = vsel %vm53_vm0, %v48_v37, %v36_v14  ;;  %v54_v43 = vsel %vm53_vm0, %v44_v28, %v48_v37  ;;  %v55_v44 = vsel %vm53_vm0, %v46_v27, %v50_v36  ;;  %v2229_v19 = vld [vmem:[%s3706_s1 + $0x30] sm:$0xff] }
  0x82   :  { %v84_v45 = vmul.f32 %v67_v33, %v60_v42  ;;  %v88_v46 = vmul.f32 %v67_v33, %v61_v41  ;;  %v87_v47 = vmul.f32 %v79_v34, %v54_v43  ;;  %v91_v48 = vmul.f32 %v79_v34, %v55_v44  ;;  %603 = vperm.xlu1 %1901, %v595_v35   ;;  %v2253_v35 = vld [vmem:[%s3706_s1 + $0x38] sm:$0xff] }
  0x83   :  { %598 = vperm.xlu0 %1900, %v594_v40   ;;  %v1853_v40 = vld [vmem:[%s3703_s2 + $0x2] ss:$8 sm:$0xf] }
  0x84   :  { %v103_v50 = vpop.permute.xlu1 %102  ;;  %v101_v51 = vpop.permute.xlu0 %100  ;;  %v92_v52 = vpack.c.bf16 %v88_v46, %v84_v45  ;;  %v95_v53 = vpack.c.bf16 %v91_v48, %v87_v47  ;;  %v199_v46 = vrot.slane %v1853_v40, %v2124_v11 }
  0x86   :  { %620 = vmatpush1.bf16.msra.mxu0 %v92_v52  ;;  %662 = vmatprep.subr.bf16.mxu1 %v95_v53  ;;  %v203_v53 = vrot.slane %v1853_v40, %v2140_v20 }
  0x87   :  { %663 = vmatpush1.bf16.msra.mxu1 %v94_v55  ;;  %721 = vrot.lane.b32.xlu1 %v2185_v54, %s1917_s28 }
  0x88   :  { %v107_v58 = vpop.permute.xlu1 %106  ;;  %v105_v59 = vpop.permute.xlu0 %104  ;;  %723 = vrot.lane.b32.xlu0 %v2190_v56, %s1917_s28 }
  0x89   :  { %v122_v61 = vsel %vm116_vm2, %v103_v50, %v107_v58  ;;  %v121_v62 = vsel %vm116_vm2, %v101_v51, %v105_v59 }
  0x8a   :  { %v153_v8 = vmul.f32 %v135_v57, %v122_v61  ;;  %v149_v9 = vmul.f32 %v135_v57, %v121_v62  ;;  %v195_v62 = vrot.slane %v1853_v40, %v2144_v22 }
  0x8b   :  { %729 = vrot.lane.b32.xlu1 %v2201_v60, %s1917_s28 }
  0x8c   :  { %v111_v13 = vpop.permute.xlu1 %110  ;;  %v109_v14 = vpop.permute.xlu0 %108  ;;  %v157_v15 = vpack.c.bf16 %v153_v8, %v149_v9  ;;  %731 = vrot.lane.b32.xlu0 %v2210_v63, %s1917_s28  ;;  %v207_v8 = vrot.slane %v1853_v40, %v2150_v25 }
  0x8d   :  { %v120_v17 = vsel %vm116_vm2, %v107_v58, %v111_v13  ;;  %v119_v18 = vsel %vm116_vm2, %v105_v59, %v109_v14 }
  0x8e   :  { %621 = vmatprep.subr.bf16.mxu0 %v157_v15  ;;  %v154_v24 = vmul.f32 %v139_v12, %v120_v17  ;;  %v150_v27 = vmul.f32 %v139_v12, %v119_v18 }
  0x8f   :  { %737 = vrot.lane.b32.xlu1 %v2220_v16, %s1917_s28 }
  0x90   :  { %v115_v28 = vpop.permute.xlu1 %114  ;;  %v113_v29 = vpop.permute.xlu0 %112  ;;  %739 = vrot.lane.b32.xlu0 %v2229_v19, %s1917_s28  ;;  %v158_v45 = vpack.c.bf16 %v154_v24, %v150_v27 }
  0x91   :  { %v118_v31 = vsel %vm116_vm2, %v111_v13, %v115_v28  ;;  %v124_v32 = vsel %vm116_vm2, %v115_v28, %v103_v50  ;;  %v117_v33 = vsel %vm116_vm2, %v109_v14, %v113_v29  ;;  %v123_v34 = vsel %vm116_vm2, %v113_v29, %v101_v51  ;;  %v1854_v29 = vld [vmem:[%s3703_s2 + $0x3] ss:$8 sm:$0xf] }
  0x92   :  { %v152_v36 = vmul.f32 %v131_v21, %v124_v32  ;;  %v155_v37 = vmul.f32 %v143_v23, %v118_v31  ;;  %v148_v38 = vmul.f32 %v131_v21, %v123_v34  ;;  %v151_v39 = vmul.f32 %v143_v23, %v117_v33 }
  0x93   :  { %745 = vrot.lane.b32.xlu1 %v2240_v30, %s1917_s28 }
  0x94   :  { %v167_v41 = vpop.permute.xlu1 %166  ;;  %v165_v42 = vpop.permute.xlu0 %164  ;;  %v156_v43 = vpack.c.bf16 %v152_v36, %v148_v38  ;;  %v159_v44 = vpack.c.bf16 %v155_v37, %v151_v39  ;;  %747 = vrot.lane.b32.xlu0 %v2253_v35, %s1917_s28  ;;  %v263_v37 = vrot.slane %v1854_v29, %v2124_v11 }
  0x96   :  { %622 = vmatpush1.bf16.msra.mxu0 %v156_v43  ;;  %664 = vmatprep.subr.bf16.mxu1 %v159_v44  ;;  %v267_v44 = vrot.slane %v1854_v29, %v2140_v20 }
  0x97   :  { %665 = vmatpush1.bf16.msra.mxu1 %v158_v45  ;;  %823 = vrot.lane.b32.xlu1 %v2185_v54, %s1918_s18 }
  0x98   :  { %v171_v47 = vpop.permute.xlu1 %170  ;;  %v169_v48 = vpop.permute.xlu0 %168  ;;  %825 = vrot.lane.b32.xlu0 %v2190_v56, %s1918_s18 }
  0x99   :  { %v186_v49 = vsel %vm180_vm3, %v167_v41, %v171_v47  ;;  %v185_v50 = vsel %vm180_vm3, %v165_v42, %v169_v48 }
  0x9a   :  { %v217_v51 = vmul.f32 %v199_v46, %v186_v49  ;;  %v213_v52 = vmul.f32 %v199_v46, %v185_v50  ;;  %v259_v50 = vrot.slane %v1854_v29, %v2144_v22 }
  0x9b   :  { %831 = vrot.lane.b32.xlu1 %v2201_v60, %s1918_s18 }
  0x9c   :  { %v175_v55 = vpop.permute.xlu1 %174  ;;  %v173_v57 = vpop.permute.xlu0 %172  ;;  %v221_v58 = vpack.c.bf16 %v217_v51, %v213_v52  ;;  %833 = vrot.lane.b32.xlu0 %v2210_v63, %s1918_s18  ;;  %v271_v51 = vrot.slane %v1854_v29, %v2150_v25 }
  0x9d   :  { %v184_v59 = vsel %vm180_vm3, %v171_v47, %v175_v55  ;;  %v183_v61 = vsel %vm180_vm3, %v169_v48, %v173_v57 }
  0x9e   :  { %623 = vmatprep.subr.bf16.mxu0 %v221_v58  ;;  %v218_v9 = vmul.f32 %v203_v53, %v184_v59  ;;  %v214_v12 = vmul.f32 %v203_v53, %v183_v61 }
  0x9f   :  { %839 = vrot.lane.b32.xlu1 %v2220_v16, %s1918_s18 }
  0xa0   :  { %v179_v13 = vpop.permute.xlu1 %178  ;;  %v177_v14 = vpop.permute.xlu0 %176  ;;  %841 = vrot.lane.b32.xlu0 %v2229_v19, %s1918_s18  ;;  %v222_v36 = vpack.c.bf16 %v218_v9, %v214_v12 }
  0xa1   :  { %v182_v15 = vsel %vm180_vm3, %v175_v55, %v179_v13  ;;  %v188_v17 = vsel %vm180_vm3, %v179_v13, %v167_v41  ;;  %v181_v18 = vsel %vm180_vm3, %v173_v57, %v177_v14  ;;  %v187_v21 = vsel %vm180_vm3, %v177_v14, %v165_v42 }
  0xa2   :  { %v216_v23 = vmul.f32 %v195_v62, %v188_v17  ;;  %v219_v24 = vmul.f32 %v207_v8, %v182_v15  ;;  %v212_v27 = vmul.f32 %v195_v62, %v187_v21  ;;  %v215_v28 = vmul.f32 %v207_v8, %v181_v18 }
  0xa3   :  { %847 = vrot.lane.b32.xlu1 %v2240_v30, %s1918_s18  ;;  %v293_v14 = vpack.c.bf16 %v1983_v2, %v1969_v0  ;;  %v292_v0 = vpack.c.bf16 %v1988_v3, %v1974_v1  ;;  %v294_v2 = vpack.c.bf16 %v1997_v4, %v2002_v5 }
  0xa4   :  { %v231_v31 = vpop.permute.xlu1 %230  ;;  %v229_v32 = vpop.permute.xlu0 %228  ;;  %v220_v33 = vpack.c.bf16 %v216_v23, %v212_v27  ;;  %v223_v34 = vpack.c.bf16 %v219_v24, %v215_v28  ;;  %849 = vrot.lane.b32.xlu0 %v2253_v35, %s1918_s18  ;;  %v295_v23 = vpack.c.bf16 %v2011_v6, %v2016_v7  ;;  %v1855_v27 = vld [vmem:[%s3703_s2 + $0x4] ss:$8 sm:$0xf] }
  0xa5   :  { %v331_v6 = vrot.slane %v1855_v27, %v2144_v22  ;;  %v335_v1 = vrot.slane %v1855_v27, %v2124_v11 }
  0xa6   :  { %624 = vmatpush1.bf16.msra.mxu0 %v220_v33  ;;  %666 = vmatprep.subr.bf16.mxu1 %v223_v34 }
  0xa7   :  { %667 = vmatpush1.bf16.msra.mxu1 %v222_v36  ;;  %925 = vrot.lane.b32.xlu1 %v2185_v54, %s1919_s0 }
  0xa8   :  { %v235_v38 = vpop.permute.xlu1 %234  ;;  %v233_v39 = vpop.permute.xlu0 %232  ;;  %927 = vrot.lane.b32.xlu0 %v2190_v56, %s1919_s0 }
  0xa9   :  { %v250_v40 = vsel %vm244_vm4, %v231_v31, %v235_v38  ;;  %v249_v41 = vsel %vm244_vm4, %v229_v32, %v233_v39 }
  0xaa   :  { %v281_v42 = vmul.f32 %v263_v37, %v250_v40  ;;  %v277_v43 = vmul.f32 %v263_v37, %v249_v41 }
  0xab   :  { %933 = vrot.lane.b32.xlu1 %v2201_v60, %s1919_s0 }
  0xac   :  { %v239_v45 = vpop.permute.xlu1 %238  ;;  %v237_v46 = vpop.permute.xlu0 %236  ;;  %v285_v47 = vpack.c.bf16 %v281_v42, %v277_v43  ;;  %935 = vrot.lane.b32.xlu0 %v2210_v63, %s1919_s0 }
  0xad   :  { %v248_v48 = vsel %vm244_vm4, %v235_v38, %v239_v45  ;;  %v247_v49 = vsel %vm244_vm4, %v233_v39, %v237_v46  ;;  %v339_v38 = vrot.slane %v1855_v27, %v2140_v20  ;;  %v343_v39 = vrot.slane %v1855_v27, %v2150_v25 }
  0xae   :  { %625 = vmatprep.subr.bf16.mxu0 %v285_v47  ;;  %v282_v52 = vmul.f32 %v267_v44, %v248_v48  ;;  %v278_v53 = vmul.f32 %v267_v44, %v247_v49 }
  0xaf   :  { %941 = vrot.lane.b32.xlu1 %v2220_v16, %s1919_s0 }
  0xb0   :  { %v243_v55 = vpop.permute.xlu1 %242  ;;  %v241_v57 = vpop.permute.xlu0 %240  ;;  %943 = vrot.lane.b32.xlu0 %v2229_v19, %s1919_s0  ;;  %v286_v24 = vpack.c.bf16 %v282_v52, %v278_v53 }
  0xb1   :  { %v246_v58 = vsel %vm244_vm4, %v239_v45, %v243_v55  ;;  %v252_v59 = vsel %vm244_vm4, %v243_v55, %v231_v31  ;;  %v245_v61 = vsel %vm244_vm4, %v237_v46, %v241_v57  ;;  %v251_v62 = vsel %vm244_vm4, %v241_v57, %v229_v32 }
  0xb2   :  { %v280_v8 = vmul.f32 %v259_v50, %v252_v59  ;;  %v283_v9 = vmul.f32 %v271_v51, %v246_v58  ;;  %v276_v12 = vmul.f32 %v259_v50, %v251_v62  ;;  %v279_v13 = vmul.f32 %v271_v51, %v245_v61  ;;  %v1856_v58 = vld [vmem:[%s3703_s2 + $0x5] ss:$8 sm:$0xf] }
  0xb3   :  { %949 = vrot.lane.b32.xlu1 %v2240_v30, %s1919_s0  ;;  %v395_v59 = vrot.slane %v1856_v58, %v2144_v22  ;;  %v403_v27 = vrot.slane %v1856_v58, %v2140_v20 }
  0xb4   :  { %v303_v15 = vpop.permute.xlu1 %302  ;;  %v301_v17 = vpop.permute.xlu0 %300  ;;  %v284_v18 = vpack.c.bf16 %v280_v8, %v276_v12  ;;  %v287_v21 = vpack.c.bf16 %v283_v9, %v279_v13  ;;  %951 = vrot.lane.b32.xlu0 %v2253_v35, %s1919_s0  ;;  %v399_v12 = vrot.slane %v1856_v58, %v2124_v11 }
  0xb6   :  { %626 = vmatpush1.bf16.msra.mxu0 %v284_v18  ;;  %668 = vmatprep.subr.bf16.mxu1 %v287_v21 }
  0xb7   :  { %669 = vmatpush1.bf16.msra.mxu1 %v286_v24  ;;  %627 = vmatprep.subr.bf16.mxu0 %v293_v14 }
  0xb8   :  { %v307_v7 = vpop.permute.xlu1 %306  ;;  %v305_v28 = vpop.permute.xlu0 %304  ;;  %670 = vmatprep.subr.bf16.mxu1 %v295_v23  ;;  %1027 = vrot.lane.b32.xlu1 %v2185_v54, %s1920_s19 }
  0xb9   :  { %v322_v29 = vsel %vm316_vm5, %v303_v15, %v307_v7  ;;  %v321_v31 = vsel %vm316_vm5, %v301_v17, %v305_v28  ;;  %1029 = vrot.lane.b32.xlu0 %v2190_v56, %s1920_s19 }
  0xba   :  { %628 = vmatpush1.bf16.msra.mxu0 %v292_v0  ;;  %v352_v3 = vmul.f32 %v331_v6, %v322_v29  ;;  %v348_v4 = vmul.f32 %v331_v6, %v321_v31  ;;  %v407_v0 = vrot.slane %v1856_v58, %v2150_v25 }
  0xbb   :  { %671 = vmatpush1.bf16.msra.mxu1 %v294_v2 }
  0xbc   :  { %v311_v5 = vpop.permute.xlu1 %310  ;;  %v309_v32 = vpop.permute.xlu0 %308  ;;  %1035 = vrot.lane.b32.xlu1 %v2201_v60, %s1920_s19  ;;  %v356_v43 = vpack.c.bf16 %v352_v3, %v348_v4 }
  0xbd   :  { %v320_v33 = vsel %vm316_vm5, %v307_v7, %v311_v5  ;;  %v319_v34 = vsel %vm316_vm5, %v305_v28, %v309_v32  ;;  %1037 = vrot.lane.b32.xlu0 %v2210_v63, %s1920_s19 }
  0xbe   :  { %v353_v36 = vmul.f32 %v335_v1, %v320_v33  ;;  %v349_v37 = vmul.f32 %v335_v1, %v319_v34 }
  0xc0   :  { %v315_v40 = vpop.permute.xlu1 %314  ;;  %v313_v41 = vpop.permute.xlu0 %312  ;;  %v357_v42 = vpack.c.bf16 %v353_v36, %v349_v37  ;;  %1043 = vrot.lane.b32.xlu1 %v2220_v16, %s1920_s19 }
  0xc1   :  { %v318_v44 = vsel %vm316_vm5, %v311_v5, %v315_v40  ;;  %v324_v45 = vsel %vm316_vm5, %v315_v40, %v303_v15  ;;  %v317_v46 = vsel %vm316_vm5, %v309_v32, %v313_v41  ;;  %v323_v47 = vsel %vm316_vm5, %v313_v41, %v301_v17  ;;  %1045 = vrot.lane.b32.xlu0 %v2229_v19, %s1920_s19 }
  0xc2   :  { %v354_v48 = vmul.f32 %v339_v38, %v318_v44  ;;  %v355_v49 = vmul.f32 %v343_v39, %v324_v45  ;;  %v350_v50 = vmul.f32 %v339_v38, %v317_v46  ;;  %v351_v51 = vmul.f32 %v343_v39, %v323_v47  ;;  %629 = vmatprep.subr.bf16.mxu0 %v357_v42  ;;  %v1857_v39 = vld [vmem:[%s3703_s2 + $0x6] ss:$8 sm:$0xf] }
  0xc3   :  { %630 = vmatpush1.bf16.msra.mxu0 %v356_v43  ;;  %v459_v40 = vrot.slane %v1857_v39, %v2144_v22  ;;  %v463_v45 = vrot.slane %v1857_v39, %v2124_v11 }
  0xc4   :  { %v367_v52 = vpop.permute.xlu1 %366  ;;  %v365_v53 = vpop.permute.xlu0 %364  ;;  %v359_v55 = vpack.c.bf16 %v355_v49, %v351_v51  ;;  %v358_v57 = vpack.c.bf16 %v354_v48, %v350_v50  ;;  %1051 = vrot.lane.b32.xlu1 %v2240_v30, %s1920_s19 }
  0xc5   :  { %1053 = vrot.lane.b32.xlu0 %v2253_v35, %s1920_s19 }
  0xc6   :  { %672 = vmatprep.subr.bf16.mxu1 %v359_v55  ;;  %v467_v55 = vrot.slane %v1857_v39, %v2140_v20 }
  0xc7   :  { %673 = vmatpush1.bf16.msra.mxu1 %v358_v57  ;;  %v471_v57 = vrot.slane %v1857_v39, %v2150_v25 }
  0xc8   :  { %v371_v61 = vpop.permute.xlu1 %370  ;;  %v369_v62 = vpop.permute.xlu0 %368  ;;  %1145 = vrot.lane.b32.xlu1 %v2185_v54, %s1921_s20 }
  0xc9   :  { %v386_v8 = vsel %vm380_vm6, %v367_v52, %v371_v61  ;;  %v385_v9 = vsel %vm380_vm6, %v365_v53, %v369_v62  ;;  %1147 = vrot.lane.b32.xlu0 %v2190_v56, %s1921_s20 }
  0xca   :  { %v416_v13 = vmul.f32 %v395_v59, %v386_v8  ;;  %v412_v14 = vmul.f32 %v395_v59, %v385_v9 }
  0xcc   :  { %v375_v15 = vpop.permute.xlu1 %374  ;;  %v373_v17 = vpop.permute.xlu0 %372  ;;  %1153 = vrot.lane.b32.xlu1 %v2201_v60, %s1921_s20  ;;  %v420_v28 = vpack.c.bf16 %v416_v13, %v412_v14 }
  0xcd   :  { %v384_v18 = vsel %vm380_vm6, %v371_v61, %v375_v15  ;;  %v383_v21 = vsel %vm380_vm6, %v369_v62, %v373_v17  ;;  %1155 = vrot.lane.b32.xlu0 %v2210_v63, %s1921_s20 }
  0xce   :  { %v417_v23 = vmul.f32 %v399_v12, %v384_v18  ;;  %v413_v24 = vmul.f32 %v399_v12, %v383_v21 }
  0xd0   :  { %v379_v2 = vpop.permute.xlu1 %378  ;;  %v377_v6 = vpop.permute.xlu0 %376  ;;  %v421_v7 = vpack.c.bf16 %v417_v23, %v413_v24  ;;  %1161 = vrot.lane.b32.xlu1 %v2220_v16, %s1921_s20 }
  0xd1   :  { %v382_v29 = vsel %vm380_vm6, %v375_v15, %v379_v2  ;;  %v388_v31 = vsel %vm380_vm6, %v379_v2, %v367_v52  ;;  %v381_v1 = vsel %vm380_vm6, %v373_v17, %v377_v6  ;;  %v387_v3 = vsel %vm380_vm6, %v377_v6, %v365_v53  ;;  %1163 = vrot.lane.b32.xlu0 %v2229_v19, %s1921_s20 }
  0xd2   :  { %v418_v4 = vmul.f32 %v403_v27, %v382_v29  ;;  %v419_v5 = vmul.f32 %v407_v0, %v388_v31  ;;  %v414_v32 = vmul.f32 %v403_v27, %v381_v1  ;;  %v415_v33 = vmul.f32 %v407_v0, %v387_v3  ;;  %631 = vmatprep.subr.bf16.mxu0 %v421_v7  ;;  %v1858_v0 = vld [vmem:[%s3703_s2 + $0x7] ss:$8 sm:$0xf] }
  0xd3   :  { %632 = vmatpush1.bf16.msra.mxu0 %v420_v28  ;;  %v523_v2 = vrot.slane %v1858_v0, %v2144_v22  ;;  %v527_v31 = vrot.slane %v1858_v0, %v2124_v11 }
  0xd4   :  { %v431_v34 = vpop.permute.xlu1 %430  ;;  %v429_v36 = vpop.permute.xlu0 %428  ;;  %v423_v37 = vpack.c.bf16 %v419_v5, %v415_v33  ;;  %v422_v38 = vpack.c.bf16 %v418_v4, %v414_v32  ;;  %1169 = vrot.lane.b32.xlu1 %v2240_v30, %s1921_s20 }
  0xd5   :  { %1171 = vrot.lane.b32.xlu0 %v2253_v35, %s1921_s20 }
  0xd6   :  { %674 = vmatprep.subr.bf16.mxu1 %v423_v37  ;;  %v531_v37 = vrot.slane %v1858_v0, %v2140_v20 }
  0xd7   :  { %675 = vmatpush1.bf16.msra.mxu1 %v422_v38  ;;  %v535_v38 = vrot.slane %v1858_v0, %v2150_v25 }
  0xd8   :  { %v435_v41 = vpop.permute.xlu1 %434  ;;  %v433_v42 = vpop.permute.xlu0 %432  ;;  %1247 = vrot.lane.b32.xlu1 %v2185_v54, %s1922_s21 }
  0xd9   :  { %v450_v43 = vsel %vm444_vm7, %v431_v34, %v435_v41  ;;  %v449_v44 = vsel %vm444_vm7, %v429_v36, %v433_v42  ;;  %1249 = vrot.lane.b32.xlu0 %v2190_v56, %s1922_s21 }
  0xda   :  { %v480_v46 = vmul.f32 %v459_v40, %v450_v43  ;;  %v476_v47 = vmul.f32 %v459_v40, %v449_v44 }
  0xdc   :  { %v439_v48 = vpop.permute.xlu1 %438  ;;  %v437_v49 = vpop.permute.xlu0 %436  ;;  %1255 = vrot.lane.b32.xlu1 %v2201_v60, %s1922_s21  ;;  %v484_v62 = vpack.c.bf16 %v480_v46, %v476_v47 }
  0xdd   :  { %v448_v50 = vsel %vm444_vm7, %v435_v41, %v439_v48  ;;  %v447_v51 = vsel %vm444_vm7, %v433_v42, %v437_v49  ;;  %1257 = vrot.lane.b32.xlu0 %v2210_v63, %s1922_s21 }
  0xde   :  { %v481_v52 = vmul.f32 %v463_v45, %v448_v50  ;;  %v477_v53 = vmul.f32 %v463_v45, %v447_v51  ;;  %v1902_v51 = vld [vmem:[%s3704_s3] ss:$8 sps:$4 sm:$0xff]  }
  0xe0   :  { %v443_v58 = vpop.permute.xlu1 %442  ;;  %v441_v59 = vpop.permute.xlu0 %440  ;;  %v485_v61 = vpack.c.bf16 %v481_v52, %v477_v53  ;;  %1263 = vrot.lane.b32.xlu1 %v2220_v16, %s1922_s21 }
  0xe1   :  { %v446_v8 = vsel %vm444_vm7, %v439_v48, %v443_v58  ;;  %v452_v9 = vsel %vm444_vm7, %v443_v58, %v431_v34  ;;  %v445_v12 = vsel %vm444_vm7, %v437_v49, %v441_v59  ;;  %v451_v13 = vsel %vm444_vm7, %v441_v59, %v429_v36  ;;  %1265 = vrot.lane.b32.xlu0 %v2229_v19, %s1922_s21 }
  0xe2   :  { %v482_v14 = vmul.f32 %v467_v55, %v446_v8  ;;  %v483_v15 = vmul.f32 %v471_v57, %v452_v9  ;;  %v478_v17 = vmul.f32 %v467_v55, %v445_v12  ;;  %v479_v18 = vmul.f32 %v471_v57, %v451_v13  ;;  %633 = vmatprep.subr.bf16.mxu0 %v485_v61 }
  0xe3   :  { %634 = vmatpush1.bf16.msra.mxu0 %v484_v62 }
  0xe4   :  { %v495_v21 = vpop.permute.xlu1 %494  ;;  %v493_v23 = vpop.permute.xlu0 %492  ;;  %v487_v24 = vpack.c.bf16 %v483_v15, %v479_v18  ;;  %v486_v27 = vpack.c.bf16 %v482_v14, %v478_v17  ;;  %1271 = vrot.lane.b32.xlu1 %v2240_v30, %s1922_s21 }
  0xe5   :  { %1273 = vrot.lane.b32.xlu0 %v2253_v35, %s1922_s21 }
  0xe6   :  { %676 = vmatprep.subr.bf16.mxu1 %v487_v24 }
  0xe7   :  { %677 = vmatpush1.bf16.msra.mxu1 %v486_v27 }
  0xe8   :  { %v499_v6 = vpop.permute.xlu1 %498  ;;  %v497_v7 = vpop.permute.xlu0 %496  ;;  %1349 = vrot.lane.b32.xlu1 %v2185_v54, %s1923_s22 }
  0xe9   :  { %v514_v28 = vsel %vm508_vm8, %v495_v21, %v499_v6  ;;  %v513_v29 = vsel %vm508_vm8, %v493_v23, %v497_v7  ;;  %1351 = vrot.lane.b32.xlu0 %v2190_v56, %s1923_s22 }
  0xea   :  { %v544_v1 = vmul.f32 %v523_v2, %v514_v28  ;;  %v540_v3 = vmul.f32 %v523_v2, %v513_v29 }
  0xec   :  { %v503_v4 = vpop.permute.xlu1 %502  ;;  %v501_v5 = vpop.permute.xlu0 %500  ;;  %1357 = vrot.lane.b32.xlu1 %v2201_v60, %s1923_s22  ;;  %v548_v42 = vpack.c.bf16 %v544_v1, %v540_v3 }
  0xed   :  { %v512_v32 = vsel %vm508_vm8, %v499_v6, %v503_v4  ;;  %v511_v33 = vsel %vm508_vm8, %v497_v7, %v501_v5  ;;  %1359 = vrot.lane.b32.xlu0 %v2210_v63, %s1923_s22 }
  0xee   :  { %v545_v34 = vmul.f32 %v527_v31, %v512_v32  ;;  %v541_v36 = vmul.f32 %v527_v31, %v511_v33 }
  0xf0   :  { %v507_v39 = vpop.permute.xlu1 %506  ;;  %v505_v40 = vpop.permute.xlu0 %504  ;;  %v549_v41 = vpack.c.bf16 %v545_v34, %v541_v36  ;;  %1365 = vrot.lane.b32.xlu1 %v2220_v16, %s1923_s22 }
  0xf1   :  { %v510_v43 = vsel %vm508_vm8, %v503_v4, %v507_v39  ;;  %v516_v44 = vsel %vm508_vm8, %v507_v39, %v495_v21  ;;  %v509_v45 = vsel %vm508_vm8, %v501_v5, %v505_v40  ;;  %v515_v46 = vsel %vm508_vm8, %v505_v40, %v493_v23  ;;  %1367 = vrot.lane.b32.xlu0 %v2229_v19, %s1923_s22 }
  0xf2   :  { %v546_v47 = vmul.f32 %v531_v37, %v510_v43  ;;  %v547_v48 = vmul.f32 %v535_v38, %v516_v44  ;;  %v542_v49 = vmul.f32 %v531_v37, %v509_v45  ;;  %v543_v50 = vmul.f32 %v535_v38, %v515_v46  ;;  %635 = vmatprep.subr.bf16.mxu0 %v549_v41 }
  0xf3   :  { %636 = vmatpush1.bf16.msra.mxu0 %v548_v42 }
  0xf4   :  { %v551_v52 = vpack.c.bf16 %v547_v48, %v543_v50  ;;  %v550_v53 = vpack.c.bf16 %v546_v47, %v542_v49  ;;  %1373 = vrot.lane.b32.xlu1 %v2240_v30, %s1923_s22 }
  0xf5   :  { %1375 = vrot.lane.b32.xlu0 %v2253_v35, %s1923_s22 }
  0xf6   :  { %652 = vmatmul.mubr.bf16.vlgmr.msra.gmra.mrb[0].mxu0 %v1902_v51  ;;  %678 = vmatprep.subr.bf16.mxu1 %v551_v52 }
  0xf7   :  { %679 = vmatpush1.bf16.msra.mxu1 %v550_v53 }
  0xf8   :  { %1451 = vrot.lane.b32.xlu1 %v2185_v54, %s1924_s23 }
  0xf9   :  { %1453 = vrot.lane.b32.xlu0 %v2190_v56, %s1924_s23 }
  0xfa   :  { %695 = vmatmul.mubr.bf16.vlgmr.msra.gmra.mrb[0].mxu1 %v1902_v51 }
  0xfc   :  { %1459 = vrot.lane.b32.xlu1 %v2201_v60, %s1924_s23  ;;  %v769_v60 = vld [vmem:[%s3703_s2] ss:$8 sm:$0xf] }
  0xfd   :  { %1461 = vrot.lane.b32.xlu0 %v2210_v63, %s1924_s23  ;;  %v2544_v13 = vrot.slane %v769_v60, %v2140_v20  ;;  %v2547_v14 = vrot.slane %v769_v60, %v2150_v25 }
 0x100   :  { %1467 = vrot.lane.b32.xlu1 %v2220_v16, %s1924_s23  ;;  %v2530_v16 = vrot.slane %v769_v60, %v2144_v22 }
 0x101   :  { %1469 = vrot.lane.b32.xlu0 %v2229_v19, %s1924_s23  ;;  %v2522_v30 = vpop.permute.xlu1 %603  ;;  %v2533_v19 = vrot.slane %v769_v60, %v2124_v11 }
 0x102   :  { %v2524_v35 = vpop.permute.xlu0 %598 }
 0x105   :  { %v722_v54 = vpop.permute.xlu1 %721 }
 0x106   :  { %v724_v55 = vpop.permute.xlu0 %723 }
 0x109   :  { %v730_v56 = vpop.permute.xlu1 %729 }
 0x10a   :  { %v732_v57 = vpop.permute.xlu0 %731  ;;  %v761_v9 = vsel %vm53_vm0, %v722_v54, %v730_v56 }
 0x10b   :  { %v762_v12 = vsel %vm53_vm0, %v724_v55, %v732_v57  ;;  %v792_v18 = vmul.f32 %v2533_v19, %v761_v9 }
 0x10c   :  { %v796_v21 = vmul.f32 %v2533_v19, %v762_v12 }
 0x10d   :  { %v738_v58 = vpop.permute.xlu1 %737 }
 0x10e   :  { %v740_v59 = vpop.permute.xlu0 %739  ;;  %v757_v23 = vsel %vm53_vm0, %v730_v56, %v738_v58  ;;  %v808_v31 = vpack.c.bf16 %v796_v21, %v792_v18 }
 0x10f   :  { %v758_v24 = vsel %vm53_vm0, %v732_v57, %v740_v59  ;;  %v793_v2 = vmul.f32 %v2544_v13, %v757_v23  ;;  %v1866_v57 = vld [vmem:[%s3703_s2 + $0x4] ss:$8 sm:$0xf] }
 0x110   :  { %v797_v6 = vmul.f32 %v2544_v13, %v758_v24  ;;  %1660 = vmatprep.subr.bf16.mxu0 %v808_v31  ;;  %v2636_v21 = vrot.slane %v1866_v57, %v2140_v20  ;;  %v2639_v23 = vrot.slane %v1866_v57, %v2150_v25  ;;  %v2642_v24 = vrot.slane %v1866_v57, %v2124_v11 }
 0x111   :  { %v746_v63 = vpop.permute.xlu1 %745 }
 0x112   :  { %v748_v61 = vpop.permute.xlu0 %747  ;;  %v765_v62 = vsel %vm53_vm0, %v746_v63, %v722_v54  ;;  %v753_v27 = vsel %vm53_vm0, %v738_v58, %v746_v63  ;;  %v809_v4 = vpack.c.bf16 %v797_v6, %v793_v2  ;;  %v2617_v58 = vrot.slane %v1866_v57, %v2144_v22  ;;  %3805 = vst [vmem:[#allocation7_spill] sm:$0xff] %v2636_v21 }
 0x113   :  { %v766_v8 = vsel %vm53_vm0, %v748_v61, %v724_v55  ;;  %v791_v15 = vmul.f32 %v2530_v16, %v765_v62  ;;  %v754_v0 = vsel %vm53_vm0, %v740_v59, %v748_v61  ;;  %v794_v28 = vmul.f32 %v2547_v14, %v753_v27  ;;  %3806 = vst [vmem:[#allocation8_spill] sm:$0xff] %v2639_v23 }
 0x114   :  { %v795_v17 = vmul.f32 %v2530_v16, %v766_v8  ;;  %v798_v29 = vmul.f32 %v2547_v14, %v754_v0  ;;  %3802 = vst [vmem:[#allocation4_spill] sm:$0xff] %v2617_v58  ;;  %3807 = vst [vmem:[#allocation9_spill] sm:$0xff] %v2642_v24 }
 0x115   :  { %v2565_v1 = vpop.permute.xlu1 %823 }
 0x116   :  { %v807_v7 = vpack.c.bf16 %v795_v17, %v791_v15  ;;  %v2567_v3 = vpop.permute.xlu0 %825  ;;  %v810_v5 = vpack.c.bf16 %v798_v29, %v794_v28 }
 0x118   :  { %1661 = vmatpush1.bf16.msra.mxu0 %v807_v7  ;;  %1746 = vmatprep.subr.bf16.mxu1 %v810_v5 }
 0x119   :  { %v2569_v32 = vpop.permute.xlu1 %831  ;;  %1747 = vmatpush1.bf16.msra.mxu1 %v809_v4 }
 0x11a   :  { %v2571_v33 = vpop.permute.xlu0 %833 }
 0x11d   :  { %v2573_v34 = vpop.permute.xlu1 %839 }
 0x11e   :  { %v2575_v36 = vpop.permute.xlu0 %841 }
 0x121   :  { %v2577_v37 = vpop.permute.xlu1 %847 }
 0x122   :  { %v2579_v38 = vpop.permute.xlu0 %849 }
 0x125   :  { %v2581_v39 = vpop.permute.xlu1 %925 }
 0x126   :  { %v2583_v40 = vpop.permute.xlu0 %927 }
 0x129   :  { %v2585_v41 = vpop.permute.xlu1 %933 }
 0x12a   :  { %v2587_v42 = vpop.permute.xlu0 %935 }
 0x12d   :  { %v2589_v43 = vpop.permute.xlu1 %941 }
 0x12e   :  { %v2591_v44 = vpop.permute.xlu0 %943 }
 0x131   :  { %v2593_v45 = vpop.permute.xlu1 %949 }
 0x132   :  { %v2595_v46 = vpop.permute.xlu0 %951 }
 0x135   :  { %v2597_v47 = vpop.permute.xlu1 %1027 }
 0x136   :  { %v2599_v48 = vpop.permute.xlu0 %1029 }
 0x139   :  { %v2601_v49 = vpop.permute.xlu1 %1035 }
 0x13a   :  { %v2603_v50 = vpop.permute.xlu0 %1037 }
 0x13d   :  { %v2605_v51 = vpop.permute.xlu1 %1043 }
 0x13e   :  { %v2607_v52 = vpop.permute.xlu0 %1045 }
 0x141   :  { %v2609_v53 = vpop.permute.xlu1 %1051 }
 0x142   :  { %v2611_v54 = vpop.permute.xlu0 %1053 }
 0x145   :  { %v1146_v55 = vpop.permute.xlu1 %1145 }
 0x146   :  { %v1148_v56 = vpop.permute.xlu0 %1147 }
 0x149   :  { %v1154_v59 = vpop.permute.xlu1 %1153 }
 0x14a   :  { %v1156_v60 = vpop.permute.xlu0 %1155  ;;  %v1185_v63 = vsel %vm316_vm5, %v1146_v55, %v1154_v59 }
 0x14b   :  { %v1186_v61 = vsel %vm316_vm5, %v1148_v56, %v1156_v60  ;;  %v2624_v62 = vmul.f32 %v2617_v58, %v1185_v63 }
 0x14c   :  { %v2627_v8 = vmul.f32 %v2617_v58, %v1186_v61  ;;  %v1867_v61 = vld [vmem:[%s3703_s2 + $0x5] ss:$8 sm:$0xf] }
 0x14d   :  { %3803 = vst [vmem:[#allocation5_spill] sm:$0xff] %v2624_v62  ;;  %v1162_v12 = vpop.permute.xlu1 %1161  ;;  %v2699_v63 = vrot.slane %v1867_v61, %v2140_v20 }
 0x14e   :  { %3804 = vst [vmem:[#allocation6_spill] sm:$0xff] %v2627_v8  ;;  %v1164_v15 = vpop.permute.xlu0 %1163  ;;  %v1181_v17 = vsel %vm316_vm5, %v1154_v59, %v1162_v12 }
 0x14f   :  { %v1182_v18 = vsel %vm316_vm5, %v1156_v60, %v1164_v15  ;;  %3817 = vst [vmem:[#allocation19_spill] sm:$0xff] %v2699_v63 }
 0x150   :  { %v2668_v57 = vmul.f32 %v2642_v24, %v1182_v18 }
 0x151   :  { %v1170_v27 = vpop.permute.xlu1 %1169 }
 0x152   :  { %v1172_v0 = vpop.permute.xlu0 %1171  ;;  %v1177_v2 = vsel %vm316_vm5, %v1162_v12, %v1170_v27  ;;  %v1189_v6 = vsel %vm316_vm5, %v1170_v27, %v1146_v55  ;;  %v2665_v55 = vmul.f32 %v2642_v24, %v1181_v17  ;;  %3813 = vst [vmem:[#allocation15_spill] sm:$0xff] %v2668_v57  ;;  %v2678_v12 = vrot.slane %v1867_v61, %v2144_v22 }
 0x153   :  { %v1178_v7 = vsel %vm316_vm5, %v1164_v15, %v1172_v0  ;;  %v1190_v28 = vsel %vm316_vm5, %v1172_v0, %v1148_v56  ;;  %v2653_v29 = vmul.f32 %v2636_v21, %v1177_v2  ;;  %v2656_v31 = vmul.f32 %v2639_v23, %v1189_v6 }
 0x154   :  { %v2659_v4 = vmul.f32 %v2636_v21, %v1178_v7  ;;  %v2662_v5 = vmul.f32 %v2639_v23, %v1190_v28  ;;  %3812 = vst [vmem:[#allocation14_spill] sm:$0xff] %v2665_v55  ;;  %3814 = vst [vmem:[#allocation16_spill] sm:$0xff] %v2678_v12 }
 0x155   :  { %3808 = vst [vmem:[#allocation10_spill] sm:$0xff] %v2653_v29  ;;  %3809 = vst [vmem:[#allocation11_spill] sm:$0xff] %v2656_v31  ;;  %v1248_v59 = vpop.permute.xlu1 %1247 }
 0x156   :  { %3810 = vst [vmem:[#allocation12_spill] sm:$0xff] %v2659_v4  ;;  %3811 = vst [vmem:[#allocation13_spill] sm:$0xff] %v2662_v5  ;;  %v1250_v60 = vpop.permute.xlu0 %1249  ;;  %v1630_v4 = vld [vmem:[%s3708_s6 + $0x8] sm:$0xff] }
 0x159   :  { %v1256_v15 = vpop.permute.xlu1 %1255 }
 0x15a   :  { %v1258_v17 = vpop.permute.xlu0 %1257  ;;  %v1287_v27 = vsel %vm380_vm6, %v1248_v59, %v1256_v15 }
 0x15b   :  { %v1288_v0 = vsel %vm380_vm6, %v1250_v60, %v1258_v17  ;;  %v2687_v2 = vmul.f32 %v2678_v12, %v1287_v27  ;;  %v2702_v27 = vrot.slane %v1867_v61, %v2150_v25 }
 0x15c   :  { %v2690_v6 = vmul.f32 %v2678_v12, %v1288_v0  ;;  %v2705_v0 = vrot.slane %v1867_v61, %v2124_v11 }
 0x15d   :  { %3815 = vst [vmem:[#allocation17_spill] sm:$0xff] %v2687_v2  ;;  %v1264_v28 = vpop.permute.xlu1 %1263  ;;  %3818 = vst [vmem:[#allocation20_spill] sm:$0xff] %v2702_v27 }
 0x15e   :  { %3816 = vst [vmem:[#allocation18_spill] sm:$0xff] %v2690_v6  ;;  %v1266_v26 = vpop.permute.xlu0 %1265  ;;  %v1283_v56 = vsel %vm380_vm6, %v1256_v15, %v1264_v28  ;;  %3819 = vst [vmem:[#allocation21_spill] sm:$0xff] %v2705_v0 }
 0x15f   :  { %v1284_v9 = vsel %vm380_vm6, %v1258_v17, %v1266_v26 }
 0x161   :  { %v1272_v18 = vpop.permute.xlu1 %1271 }
 0x162   :  { %v1274_v12 = vpop.permute.xlu0 %1273  ;;  %v1279_v7 = vsel %vm380_vm6, %v1264_v28, %v1272_v18  ;;  %v1291_v15 = vsel %vm380_vm6, %v1272_v18, %v1248_v59  ;;  %v2728_v59 = vmul.f32 %v2705_v0, %v1283_v56 }
 0x163   :  { %v1280_v17 = vsel %vm380_vm6, %v1266_v26, %v1274_v12  ;;  %v1292_v2 = vsel %vm380_vm6, %v1274_v12, %v1250_v60  ;;  %v2716_v6 = vmul.f32 %v2699_v63, %v1279_v7  ;;  %v2719_v61 = vmul.f32 %v2702_v27, %v1291_v15  ;;  %v1868_v15 = vld [vmem:[%s3703_s2 + $0x6] ss:$8 sm:$0xf] }
 0x164   :  { %v2722_v29 = vmul.f32 %v2699_v63, %v1280_v17  ;;  %v2725_v28 = vmul.f32 %v2702_v27, %v1292_v2  ;;  %3824 = vst [vmem:[#allocation26_spill] sm:$0xff] %v2728_v59  ;;  %v2731_v26 = vmul.f32 %v2705_v0, %v1284_v9  ;;  %v2741_v2 = vrot.slane %v1868_v15, %v2144_v22 }
 0x165   :  { %3820 = vst [vmem:[#allocation22_spill] sm:$0xff] %v2716_v6  ;;  %3821 = vst [vmem:[#allocation23_spill] sm:$0xff] %v2719_v61  ;;  %v1350_v12 = vpop.permute.xlu1 %1349  ;;  %v2762_v59 = vrot.slane %v1868_v15, %v2140_v20 }
 0x166   :  { %3822 = vst [vmem:[#allocation24_spill] sm:$0xff] %v2722_v29  ;;  %3823 = vst [vmem:[#allocation25_spill] sm:$0xff] %v2725_v28  ;;  %v1352_v18 = vpop.permute.xlu0 %1351 }
 0x167   :  { %3825 = vst [vmem:[#allocation27_spill] sm:$0xff] %v2731_v26  ;;  %3826 = vst [vmem:[#allocation28_spill] sm:$0xff] %v2741_v2 }
 0x168   :  { %3829 = vst [vmem:[#allocation31_spill] sm:$0xff] %v2762_v59 }
 0x169   :  { %v1358_v56 = vpop.permute.xlu1 %1357 }
 0x16a   :  { %v1360_v17 = vpop.permute.xlu0 %1359  ;;  %v1389_v60 = vsel %vm444_vm7, %v1350_v12, %v1358_v56 }
 0x16b   :  { %v1390_v6 = vsel %vm444_vm7, %v1352_v18, %v1360_v17  ;;  %v2750_v7 = vmul.f32 %v2741_v2, %v1389_v60  ;;  %v2765_v60 = vrot.slane %v1868_v15, %v2150_v25 }
 0x16c   :  { %v2753_v29 = vmul.f32 %v2741_v2, %v1390_v6  ;;  %v2768_v6 = vrot.slane %v1868_v15, %v2124_v11 }
 0x16d   :  { %3827 = vst [vmem:[#allocation29_spill] sm:$0xff] %v2750_v7  ;;  %v1366_v63 = vpop.permute.xlu1 %1365  ;;  %3830 = vst [vmem:[#allocation32_spill] sm:$0xff] %v2765_v60 }
 0x16e   :  { %3828 = vst [vmem:[#allocation30_spill] sm:$0xff] %v2753_v29  ;;  %v1368_v61 = vpop.permute.xlu0 %1367  ;;  %v1385_v9 = vsel %vm444_vm7, %v1358_v56, %v1366_v63  ;;  %3831 = vst [vmem:[#allocation33_spill] sm:$0xff] %v2768_v6 }
 0x16f   :  { %v1386_v28 = vsel %vm444_vm7, %v1360_v17, %v1368_v61 }
 0x171   :  { %v1374_v2 = vpop.permute.xlu1 %1373 }
 0x172   :  { %v1376_v26 = vpop.permute.xlu0 %1375  ;;  %v1381_v27 = vsel %vm444_vm7, %v1366_v63, %v1374_v2  ;;  %v1393_v56 = vsel %vm444_vm7, %v1374_v2, %v1350_v12  ;;  %v2791_v12 = vmul.f32 %v2768_v6, %v1385_v9 }
 0x173   :  { %v1382_v17 = vsel %vm444_vm7, %v1368_v61, %v1376_v26  ;;  %v1394_v7 = vsel %vm444_vm7, %v1376_v26, %v1352_v18  ;;  %v2779_v29 = vmul.f32 %v2762_v59, %v1381_v27  ;;  %v2782_v15 = vmul.f32 %v2765_v60, %v1393_v56 }
 0x174   :  { %v2785_v0 = vmul.f32 %v2762_v59, %v1382_v17  ;;  %v2788_v63 = vmul.f32 %v2765_v60, %v1394_v7  ;;  %3836 = vst [vmem:[#allocation38_spill] sm:$0xff] %v2791_v12  ;;  %v2794_v61 = vmul.f32 %v2768_v6, %v1386_v28  ;;  %v2809_v7 = vld [vmem:[%s3703_s2 + $0x7] ss:$8 sm:$0xf] }
 0x175   :  { %3832 = vst [vmem:[#allocation34_spill] sm:$0xff] %v2779_v29  ;;  %3833 = vst [vmem:[#allocation35_spill] sm:$0xff] %v2782_v15  ;;  %v2802_v2 = vpop.permute.xlu1 %1451  ;;  %v2813_v17 = vrot.slane %v2809_v7, %v2144_v22  ;;  %v1629_v6 = vld [vmem:[%s3708_s6] sm:$0xff] }
 0x176   :  { %3834 = vst [vmem:[#allocation36_spill] sm:$0xff] %v2785_v0  ;;  %3835 = vst [vmem:[#allocation37_spill] sm:$0xff] %v2788_v63  ;;  %v2804_v56 = vpop.permute.xlu0 %1453  ;;  %v2829_v0 = vrot.slane %v2809_v7, %v2124_v11 }
 0x177   :  { %3837 = vst [vmem:[#allocation39_spill] sm:$0xff] %v2794_v61  ;;  %3838 = vst [vmem:[#allocation40_spill] sm:$0xff] %v2802_v2 }
 0x178   :  { %3839 = vst [vmem:[#allocation41_spill] sm:$0xff] %v2804_v56  ;;  %3840 = vst [vmem:[#allocation42_spill] sm:$0xff] %v2809_v7 }
 0x179   :  { %v1460_v28 = vpop.permute.xlu1 %1459  ;;  %3841 = vst [vmem:[#allocation43_spill] sm:$0xff] %v2813_v17  ;;  %3844 = vst [vmem:[#allocation46_spill] sm:$0xff] %v2829_v0 }
 0x17a   :  { %v1462_v9 = vpop.permute.xlu0 %1461  ;;  %v1491_v26 = vsel %vm508_vm8, %v2802_v2, %v1460_v28 }
 0x17b   :  { %v1492_v27 = vsel %vm508_vm8, %v2804_v56, %v1462_v9  ;;  %v2822_v18 = vmul.f32 %v2813_v17, %v1491_v26 }
 0x17c   :  { %v2825_v29 = vmul.f32 %v2813_v17, %v1492_v27 }
 0x17d   :  { %3842 = vst [vmem:[#allocation44_spill] sm:$0xff] %v2822_v18  ;;  %v2831_v60 = vpop.permute.xlu1 %1467 }
 0x17e   :  { %3843 = vst [vmem:[#allocation45_spill] sm:$0xff] %v2825_v29  ;;  %3845 = vst [vmem:[#allocation47_spill] sm:$0xff] %v2831_v60  ;;  %v2833_v59 = vpop.permute.xlu0 %1469  ;;  %v1487_v63 = vsel %vm508_vm8, %v1460_v28, %v2831_v60 }
 0x17f   :  { %3846 = vst [vmem:[#allocation48_spill] sm:$0xff] %v2833_v59  ;;  %v1488_v26 = vsel %vm508_vm8, %v1462_v9, %v2833_v59  ;;  %v2844_v27 = vmul.f32 %v2829_v0, %v1487_v63 }
 0x180   :  { %v2847_v17 = vmul.f32 %v2829_v0, %v1488_v26 }
 0x181   :  { %3847 = vst [vmem:[#allocation49_spill] sm:$0xff] %v2844_v27 }
 0x182   :  { %3848 = vst [vmem:[#allocation50_spill] sm:$0xff] %v2847_v17 }
 0x1c9   :  { %v653_v12 = vpop.f32.mrb[0].mxu0 }
 0x1ca   :  { %v654_v15 = vadd.f32 %v653_v12, %v2524_v35  ;;  %v655_v18 = vpop.f32.mrb[1].mxu0 }
 0x1cb   :  { %v657_v29 = vpop.f32.mrb[2].mxu0 }
 0x1cc   :  { %v2852_v61 = vmax.f32 %v654_v15, 0.0  ;;  %v658_v28 = vadd.f32 %v657_v29, %v2522_v30  ;;  %v659_v60 = vpop.f32.mrb[3].mxu0  ;;  %v656_v15 = vadd.f32 %v655_v18, %v2524_v35 }
 0x1cd   :  { %v696_v9 = vpop.f32.mrb[0].mxu1 }
 0x1ce   :  { %3849 = vst [vmem:[#allocation51_spill] sm:$0xff] %v2852_v61  ;;  %v2855_v59 = vmax.f32 %v658_v28, 0.0  ;;  %v697_v63 = vadd.f32 %v696_v9, %v2524_v35  ;;  %v698_v26 = vpop.f32.mrb[1].mxu1  ;;  %725 = vrot.lane.b32.xlu1 %v2852_v61, %s1917_s28  ;;  %v2919_v28 = vmax.f32 %v656_v15, 0.0 }
 0x1cf   :  { %v700_v2 = vpop.f32.mrb[2].mxu1  ;;  %v699_v9 = vadd.f32 %v698_v26, %v2524_v35  ;;  %v2973_v35 = vld [vmem:[%s3706_s1 + $0x38] sm:$0xff] }
 0x1d0   :  { %3850 = vst [vmem:[#allocation52_spill] sm:$0xff] %v2855_v59  ;;  %v2860_v0 = vmax.f32 %v697_v63, 0.0  ;;  %v701_v12 = vadd.f32 %v700_v2, %v2522_v30  ;;  %v702_v27 = vpop.f32.mrb[3].mxu1  ;;  %727 = vrot.lane.b32.xlu0 %v2855_v59, %s1917_s28  ;;  %v660_v2 = vadd.f32 %v659_v60, %v2522_v30  ;;  %3853 = vst [vmem:[#allocation55_spill] sm:$0xff] %v2919_v28 }
 0x1d1   :  { %v2929_v18 = vmax.f32 %v699_v9, 0.0  ;;  %3858 = vst [vmem:[#allocation60_spill] sm:$0xff] %v2973_v35 }
 0x1d2   :  { %3851 = vst [vmem:[#allocation53_spill] sm:$0xff] %v2860_v0  ;;  %v2865_v29 = vmax.f32 %v701_v12, 0.0  ;;  %741 = vrot.lane.b32.xlu1 %v2860_v0, %s1917_s28  ;;  %v2924_v63 = vmax.f32 %v660_v2, 0.0  ;;  %v703_v12 = vadd.f32 %v702_v27, %v2522_v30  ;;  %v2966_v30 = vld [vmem:[%s3706_s1 + $0x18] sm:$0xff]  ;;  %v1907_v27 = vld [vmem:[%s3707_s5 + $0x4] ss:$12 sps:$4 sm:$0xff]  }
 0x1d3   :  { %3855 = vst [vmem:[#allocation57_spill] sm:$0xff] %v2929_v18  ;;  %3857 = vst [vmem:[#allocation59_spill] sm:$0xff] %v2966_v30  ;;  %1692 = vmatprep.mubr.bf16.mxu0 %v1907_v27  ;;  %1778 = vmatprep.mubr.bf16.mxu1 %v1907_v27 }
 0x1d4   :  { %3852 = vst [vmem:[#allocation54_spill] sm:$0xff] %v2865_v29  ;;  %743 = vrot.lane.b32.xlu0 %v2865_v29, %s1917_s28  ;;  %3854 = vst [vmem:[#allocation56_spill] sm:$0xff] %v2924_v63  ;;  %v2933_v60 = vmax.f32 %v703_v12, 0.0 }
 0x1d6   :  { %827 = vrot.lane.b32.xlu1 %v2852_v61, %s1918_s18  ;;  %3856 = vst [vmem:[#allocation58_spill] sm:$0xff] %v2933_v60 }
 0x1d8   :  { %829 = vrot.lane.b32.xlu0 %v2855_v59, %s1918_s18 }
 0x1da   :  { %843 = vrot.lane.b32.xlu1 %v2860_v0, %s1918_s18 }
 0x1dc   :  { %845 = vrot.lane.b32.xlu0 %v2865_v29, %s1918_s18 }
 0x1de   :  { %929 = vrot.lane.b32.xlu1 %v2852_v61, %s1919_s0 }
 0x1e0   :  { %931 = vrot.lane.b32.xlu0 %v2855_v59, %s1919_s0 }
 0x1e2   :  { %945 = vrot.lane.b32.xlu1 %v2860_v0, %s1919_s0 }
 0x1e4   :  { %947 = vrot.lane.b32.xlu0 %v2865_v29, %s1919_s0 }
 0x1e6   :  { %1031 = vrot.lane.b32.xlu1 %v2852_v61, %s1920_s19 }
 0x1e8   :  { %1033 = vrot.lane.b32.xlu0 %v2855_v59, %s1920_s19 }
 0x1ea   :  { %1047 = vrot.lane.b32.xlu1 %v2860_v0, %s1920_s19 }
 0x1ec   :  { %1049 = vrot.lane.b32.xlu0 %v2865_v29, %s1920_s19 }
 0x1ee   :  { %1149 = vrot.lane.b32.xlu1 %v2852_v61, %s1921_s20 }
 0x1f0   :  { %1151 = vrot.lane.b32.xlu0 %v2855_v59, %s1921_s20 }
 0x1f2   :  { %1165 = vrot.lane.b32.xlu1 %v2860_v0, %s1921_s20 }
 0x1f4   :  { %1167 = vrot.lane.b32.xlu0 %v2865_v29, %s1921_s20 }
 0x1f6   :  { %1251 = vrot.lane.b32.xlu1 %v2852_v61, %s1922_s21 }
 0x1f8   :  { %1253 = vrot.lane.b32.xlu0 %v2855_v59, %s1922_s21 }
 0x1fa   :  { %1267 = vrot.lane.b32.xlu1 %v2860_v0, %s1922_s21 }
 0x1fc   :  { %1269 = vrot.lane.b32.xlu0 %v2865_v29, %s1922_s21 }
 0x1fe   :  { %1353 = vrot.lane.b32.xlu1 %v2852_v61, %s1923_s22 }
 0x200   :  { %1355 = vrot.lane.b32.xlu0 %v2855_v59, %s1923_s22 }
 0x202   :  { %1369 = vrot.lane.b32.xlu1 %v2860_v0, %s1923_s22 }
 0x204   :  { %1371 = vrot.lane.b32.xlu0 %v2865_v29, %s1923_s22 }
 0x206   :  { %733 = vrot.lane.b32.xlu1 %v2919_v28, %s1917_s28 }
 0x208   :  { %735 = vrot.lane.b32.xlu0 %v2924_v63, %s1917_s28 }
 0x20a   :  { %749 = vrot.lane.b32.xlu1 %v2929_v18, %s1917_s28 }
 0x20c   :  { %751 = vrot.lane.b32.xlu0 %v2933_v60, %s1917_s28 }
 0x20e   :  { %835 = vrot.lane.b32.xlu1 %v2919_v28, %s1918_s18 }
 0x210   :  { %837 = vrot.lane.b32.xlu0 %v2924_v63, %s1918_s18 }
 0x212   :  { %851 = vrot.lane.b32.xlu1 %v2929_v18, %s1918_s18 }
 0x214   :  { %853 = vrot.lane.b32.xlu0 %v2933_v60, %s1918_s18 }
 0x216   :  { %937 = vrot.lane.b32.xlu1 %v2919_v28, %s1919_s0 }
 0x218   :  { %939 = vrot.lane.b32.xlu0 %v2924_v63, %s1919_s0 }
 0x21a   :  { %953 = vrot.lane.b32.xlu1 %v2929_v18, %s1919_s0 }
 0x21c   :  { %955 = vrot.lane.b32.xlu0 %v2933_v60, %s1919_s0 }
 0x21e   :  { %1039 = vrot.lane.b32.xlu1 %v2919_v28, %s1920_s19 }
 0x220   :  { %1041 = vrot.lane.b32.xlu0 %v2924_v63, %s1920_s19 }
 0x222   :  { %1055 = vrot.lane.b32.xlu1 %v2929_v18, %s1920_s19 }
 0x224   :  { %1057 = vrot.lane.b32.xlu0 %v2933_v60, %s1920_s19 }
 0x226   :  { %1475 = vrot.lane.b32.xlu1 %v2966_v30, %s1924_s23 }
 0x228   :  { %1477 = vrot.lane.b32.xlu0 %v2973_v35, %s1924_s23 }
 0x22a   :  { %1157 = vrot.lane.b32.xlu1 %v2919_v28, %s1921_s20 }
 0x22c   :  { %1457 = vrot.lane.b32.xlu0 %v2855_v59, %s1924_s23  ;;  %v1863_v59 = vld [vmem:[%s3703_s2 + $0x1] ss:$8 sm:$0xf] }
 0x22e   :  { %1173 = vrot.lane.b32.xlu1 %v2929_v18, %s1921_s20 }
 0x230   :  { %1159 = vrot.lane.b32.xlu0 %v2924_v63, %s1921_s20 }
 0x232   :  { %1259 = vrot.lane.b32.xlu1 %v2919_v28, %s1922_s21 }
 0x234   :  { %1175 = vrot.lane.b32.xlu0 %v2933_v60, %s1921_s20 }
 0x236   :  { %1275 = vrot.lane.b32.xlu1 %v2929_v18, %s1922_s21 }
 0x238   :  { %1261 = vrot.lane.b32.xlu0 %v2924_v63, %s1922_s21 }
 0x23a   :  { %1361 = vrot.lane.b32.xlu1 %v2919_v28, %s1923_s22 }
 0x23c   :  { %1277 = vrot.lane.b32.xlu0 %v2933_v60, %s1922_s21 }
 0x23e   :  { %1377 = vrot.lane.b32.xlu1 %v2929_v18, %s1923_s22 }
 0x240   :  { %1363 = vrot.lane.b32.xlu0 %v2924_v63, %s1923_s22  ;;  %v3004_v26 = vpop.permute.xlu1 %725 }
 0x242   :  { %v3006_v15 = vpop.permute.xlu0 %727  ;;  %1455 = vrot.lane.b32.xlu1 %v2852_v61, %s1924_s23  ;;  %v3076_v61 = vrot.slane %v1863_v59, %v2140_v20 }
 0x244   :  { %1379 = vrot.lane.b32.xlu0 %v2933_v60, %s1923_s22  ;;  %v3012_v2 = vpop.permute.xlu1 %741 }
 0x246   :  { %v3014_v9 = vpop.permute.xlu0 %743  ;;  %1463 = vrot.lane.b32.xlu1 %v2919_v28, %s1924_s23  ;;  %v1864_v28 = vld [vmem:[%s3703_s2 + $0x2] ss:$8 sm:$0xf] }
 0x248   :  { %1465 = vrot.lane.b32.xlu0 %v2924_v63, %s1924_s23  ;;  %v3020_v12 = vpop.permute.xlu1 %827  ;;  %v3116_v63 = vrot.slane %v1863_v59, %v2150_v25 }
 0x24a   :  { %v3022_v27 = vpop.permute.xlu0 %829  ;;  %1471 = vrot.lane.b32.xlu1 %v2860_v0, %s1924_s23 }
 0x24c   :  { %1473 = vrot.lane.b32.xlu0 %v2865_v29, %s1924_s23  ;;  %v3028_v17 = vpop.permute.xlu1 %843 }
 0x24e   :  { %v3030_v7 = vpop.permute.xlu0 %845  ;;  %1479 = vrot.lane.b32.xlu1 %v2929_v18, %s1924_s23 }
 0x250   :  { %1481 = vrot.lane.b32.xlu0 %v2933_v60, %s1924_s23  ;;  %v3039_v56 = vpop.permute.xlu1 %929  ;;  %v863_v60 = vsel %vm116_vm2, %v2565_v1, %v2569_v32 }
 0x252   :  { %v3044_v62 = vpop.permute.xlu0 %931  ;;  %1633 = vperm.xlu1 %1901, %v1629_v6  }
 0x254   :  { %1638 = vperm.xlu0 %1900, %v1630_v4   ;;  %v3046_v8 = vpop.permute.xlu1 %945 }
 0x256   :  { %v3048_v23 = vpop.permute.xlu0 %947 }
 0x258   :  { %v3050_v21 = vpop.permute.xlu1 %1031 }
 0x259   :  { %3859 = vst [vmem:[#allocation61_spill] sm:$0xff] %v3050_v21 }
 0x25a   :  { %v3052_v31 = vpop.permute.xlu0 %1033 }
 0x25b   :  { %3860 = vst [vmem:[#allocation62_spill] sm:$0xff] %v3052_v31 }
 0x25c   :  { %v3054_v5 = vpop.permute.xlu1 %1047 }
 0x25d   :  { %3861 = vst [vmem:[#allocation63_spill] sm:$0xff] %v3054_v5  ;;  %v3203_v5 = vrot.slane %v1864_v28, %v2150_v25 }
 0x25e   :  { %v3056_v58 = vpop.permute.xlu0 %1049 }
 0x25f   :  { %3862 = vst [vmem:[#allocation64_spill] sm:$0xff] %v3056_v58  ;;  %v3192_v58 = vrot.slane %v1864_v28, %v2144_v22 }
 0x260   :  { %v3058_v55 = vpop.permute.xlu1 %1149 }
 0x261   :  { %3863 = vst [vmem:[#allocation65_spill] sm:$0xff] %v3058_v55 }
 0x262   :  { %v3060_v57 = vpop.permute.xlu0 %1151 }
 0x263   :  { %3864 = vst [vmem:[#allocation66_spill] sm:$0xff] %v3060_v57  ;;  %v859_v57 = vsel %vm116_vm2, %v2569_v32, %v2573_v34  ;;  %v3135_v32 = vrot.slane %v1864_v28, %v2140_v20 }
 0x264   :  { %v3062_v24 = vpop.permute.xlu1 %1165  ;;  %v3113_v18 = vmul.f32 %v3076_v61, %v859_v57 }
 0x265   :  { %3865 = vst [vmem:[#allocation67_spill] sm:$0xff] %v3062_v24  ;;  %v868_v24 = vsel %vm116_vm2, %v2579_v38, %v2567_v3 }
 0x266   :  { %v3064_v6 = vpop.permute.xlu0 %1167 }
 0x267   :  { %3866 = vst [vmem:[#allocation68_spill] sm:$0xff] %v3064_v6  ;;  %v3094_v6 = vrot.slane %v1863_v59, %v2124_v11 }
 0x268   :  { %v3066_v4 = vpop.permute.xlu1 %1251 }
 0x269   :  { %3867 = vst [vmem:[#allocation69_spill] sm:$0xff] %v3066_v4  ;;  %v860_v4 = vsel %vm116_vm2, %v2571_v33, %v2575_v36 }
 0x26a   :  { %v3068_v29 = vpop.permute.xlu0 %1253  ;;  %v3124_v30 = vmul.f32 %v3076_v61, %v860_v4  ;;  %v965_v4 = vsel %vm180_vm3, %v2581_v39, %v2585_v41 }
 0x26b   :  { %3868 = vst [vmem:[#allocation70_spill] sm:$0xff] %v3068_v29  ;;  %v3089_v29 = vrot.slane %v1863_v59, %v2144_v22  ;;  %v961_v59 = vsel %vm180_vm3, %v2585_v41, %v2589_v43  ;;  %v970_v41 = vsel %vm180_vm3, %v2595_v46, %v2583_v40 }
 0x26c   :  { %v3070_v0 = vpop.permute.xlu1 %1267  ;;  %v3242_v21 = vmul.f32 %v3192_v58, %v970_v41 }
 0x26d   :  { %3869 = vst [vmem:[#allocation71_spill] sm:$0xff] %v3070_v0  ;;  %v3141_v57 = vmul.f32 %v3089_v29, %v868_v24  ;;  %v3160_v24 = vrot.slane %v1864_v28, %v2124_v11  ;;  %v957_v28 = vsel %vm180_vm3, %v2589_v43, %v2593_v45 }
 0x26e   :  { %v3078_v55 = vpop.permute.xlu0 %1269 }
 0x26f   :  { %3870 = vst [vmem:[#allocation72_spill] sm:$0xff] %v3078_v55  ;;  %v867_v55 = vsel %vm116_vm2, %v2577_v37, %v2565_v1  ;;  %v855_v1 = vsel %vm116_vm2, %v2573_v34, %v2577_v37  ;;  %v962_v34 = vsel %vm180_vm3, %v2587_v42, %v2591_v44  ;;  %v3154_v37 = vmul.f32 %v3094_v6, %v863_v60 }
 0x270   :  { %v3091_v0 = vpop.permute.xlu1 %1353  ;;  %v3179_v60 = vmul.f32 %v3135_v32, %v961_v59 }
 0x271   :  { %3871 = vst [vmem:[#allocation73_spill] sm:$0xff] %v3091_v0  ;;  %v864_v0 = vsel %vm116_vm2, %v2567_v3, %v2571_v33  ;;  %v856_v3 = vsel %vm116_vm2, %v2575_v36, %v2579_v38  ;;  %v3138_v33 = vmul.f32 %v3089_v29, %v867_v55  ;;  %v3163_v55 = vmul.f32 %v3116_v63, %v855_v1 }
 0x272   :  { %v3121_v35 = vpop.permute.xlu0 %1355  ;;  %v3157_v38 = vmul.f32 %v3094_v6, %v864_v0  ;;  %v966_v0 = vsel %vm180_vm3, %v2583_v40, %v2587_v42  ;;  %3875 = vst [vmem:[#allocation77_spill] sm:$0xff] %v3179_v60  ;;  %v3182_v1 = vmul.f32 %v3135_v32, %v962_v34 }
 0x273   :  { %3872 = vst [vmem:[#allocation74_spill] sm:$0xff] %v3121_v35  ;;  %v3200_v34 = vmul.f32 %v3160_v24, %v966_v0  ;;  %v958_v0 = vsel %vm180_vm3, %v2591_v44, %v2595_v46  ;;  %v3251_v46 = vmul.f32 %v3203_v5, %v957_v28 }
 0x274   :  { %v3151_v36 = vpop.permute.xlu1 %1369  ;;  %3876 = vst [vmem:[#allocation78_spill] sm:$0xff] %v3182_v1  ;;  %v910_v59 = vpack.c.bf16 %v3157_v38, %v3154_v37  ;;  %v3222_v38 = vld [vmem:[%s3703_s2 + $0x3] ss:$8 sm:$0xf] }
 0x275   :  { %3873 = vst [vmem:[#allocation75_spill] sm:$0xff] %v3151_v36  ;;  %v3172_v36 = vmul.f32 %v3116_v63, %v856_v3  ;;  %v3189_v3 = vmul.f32 %v3160_v24, %v965_v4  ;;  %v969_v4 = vsel %vm180_vm3, %v2593_v45, %v2581_v39 }
 0x276   :  { %v3169_v35 = vpop.permute.xlu0 %1371  ;;  %v3239_v1 = vmul.f32 %v3192_v58, %v969_v4 }
 0x277   :  { %3874 = vst [vmem:[#allocation76_spill] sm:$0xff] %v3169_v35  ;;  %v912_v40 = vpack.c.bf16 %v3172_v36, %v3163_v55 }
 0x278   :  { %v734_v35 = vpop.permute.xlu1 %733 }
 0x279   :  { %v763_v42 = vsel %vm53_vm0, %v3004_v26, %v734_v35 }
 0x27a   :  { %v736_v31 = vpop.permute.xlu0 %735  ;;  %v800_v37 = vmul.f32 %v2533_v19, %v763_v42  ;;  %v1067_v42 = vsel %vm244_vm4, %v2597_v47, %v2601_v49 }
 0x27b   :  { %v764_v39 = vsel %vm53_vm0, %v3006_v15, %v736_v31  ;;  %v760_v43 = vsel %vm53_vm0, %v736_v31, %v3014_v9  ;;  %v759_v31 = vsel %vm53_vm0, %v734_v35, %v3012_v2 }
 0x27c   :  { %v804_v45 = vmul.f32 %v2533_v19, %v764_v39  ;;  %v750_v60 = vpop.permute.xlu1 %749  ;;  %v3255_v19 = vrot.slane %v3222_v38, %v2124_v11  ;;  %v3276_v39 = vmul.f32 %v3203_v5, %v958_v0  ;;  %v1012_v0 = vpack.c.bf16 %v3200_v34, %v3189_v3 }
 0x27d   :  { %v755_v36 = vsel %vm53_vm0, %v3012_v2, %v750_v60  ;;  %v767_v44 = vsel %vm53_vm0, %v750_v60, %v3004_v26  ;;  %v805_v26 = vmul.f32 %v2544_v13, %v760_v43  ;;  %v801_v43 = vmul.f32 %v2544_v13, %v759_v31 }
 0x27e   :  { %v752_v55 = vpop.permute.xlu0 %751  ;;  %v812_v41 = vpack.c.bf16 %v804_v45, %v800_v37  ;;  %v799_v4 = vmul.f32 %v2530_v16, %v767_v44  ;;  %v802_v35 = vmul.f32 %v2547_v14, %v755_v36  ;;  %v3291_v44 = vmul.f32 %v3255_v19, %v1067_v42 }
 0x27f   :  { %v756_v60 = vsel %vm53_vm0, %v3014_v9, %v752_v55  ;;  %v768_v11 = vsel %vm53_vm0, %v752_v55, %v3006_v15  ;;  %v1011_v9 = vpack.c.bf16 %v3242_v21, %v3239_v1  ;;  %v3295_v13 = vrot.slane %v3222_v38, %v2140_v20 }
 0x280   :  { %v803_v2 = vmul.f32 %v2530_v16, %v768_v11  ;;  %v806_v37 = vmul.f32 %v2547_v14, %v756_v60  ;;  %1662 = vmatprep.subr.bf16.mxu0 %v812_v41  ;;  %v836_v28 = vpop.permute.xlu1 %835  ;;  %v1068_v16 = vsel %vm244_vm4, %v2599_v48, %v2603_v50  ;;  %v813_v31 = vpack.c.bf16 %v805_v26, %v801_v43 }
 0x281   :  { %v865_v15 = vsel %vm116_vm2, %v3020_v12, %v836_v28  ;;  %v3306_v42 = vmul.f32 %v3255_v19, %v1068_v16 }
 0x282   :  { %v811_v14 = vpack.c.bf16 %v803_v2, %v799_v4  ;;  %v838_v45 = vpop.permute.xlu0 %837  ;;  %v814_v36 = vpack.c.bf16 %v806_v37, %v802_v35  ;;  %v902_v41 = vmul.f32 %v3094_v6, %v865_v15  ;;  %v861_v4 = vsel %vm116_vm2, %v836_v28, %v3028_v17 }
 0x283   :  { %v866_v55 = vsel %vm116_vm2, %v3022_v27, %v838_v45  ;;  %v862_v60 = vsel %vm116_vm2, %v838_v45, %v3030_v7  ;;  %v1014_v37 = vpack.c.bf16 %v3276_v39, %v3251_v46  ;;  %v903_v15 = vmul.f32 %v3076_v61, %v861_v4  ;;  %v3879_v4 = vld [vmem:[#allocation61_spill] sm:$0xff] }
 0x284   :  { %v906_v3 = vmul.f32 %v3094_v6, %v866_v55  ;;  %1663 = vmatpush1.bf16.msra.mxu0 %v811_v14  ;;  %1748 = vmatprep.subr.bf16.mxu1 %v814_v36  ;;  %v852_v34 = vpop.permute.xlu1 %851  ;;  %v1063_v6 = vsel %vm244_vm4, %v2601_v49, %v2605_v51 }
 0x285   :  { %v857_v26 = vsel %vm116_vm2, %v3028_v17, %v852_v34  ;;  %v869_v11 = vsel %vm116_vm2, %v852_v34, %v3020_v12  ;;  %1664 = vmatprep.subr.bf16.mxu0 %v910_v59  ;;  %1749 = vmatpush1.bf16.msra.mxu1 %v813_v31  ;;  %v1064_v12 = vsel %vm244_vm4, %v2603_v50, %v2607_v52 }
 0x286   :  { %v854_v35 = vpop.permute.xlu0 %853  ;;  %1750 = vmatprep.subr.bf16.mxu1 %v912_v40  ;;  %v914_v2 = vpack.c.bf16 %v906_v3, %v902_v41  ;;  %v907_v59 = vmul.f32 %v3076_v61, %v862_v60  ;;  %v901_v40 = vmul.f32 %v3089_v29, %v869_v11  ;;  %v904_v28 = vmul.f32 %v3116_v63, %v857_v26 }
 0x287   :  { %v858_v49 = vsel %vm116_vm2, %v3030_v7, %v854_v35  ;;  %v870_v17 = vsel %vm116_vm2, %v854_v35, %v3022_v27  ;;  %v3877_v50 = vpack.c.bf16 %v3141_v57, %v3138_v33  ;;  %v3343_v7 = vrot.slane %v3222_v38, %v2144_v22  ;;  %v3880_v35 = vld [vmem:[#allocation78_spill] sm:$0xff] }
 0x288   :  { %v905_v46 = vmul.f32 %v3089_v29, %v870_v17  ;;  %v908_v39 = vmul.f32 %v3116_v63, %v858_v49  ;;  %v938_v43 = vpop.permute.xlu1 %937  ;;  %v3878_v29 = vpack.c.bf16 %v3124_v30, %v3113_v18  ;;  %v3353_v63 = vmul.f32 %v3295_v13, %v1063_v6 }
 0x289   :  { %1665 = vmatpush1.bf16.msra.mxu0 %v3877_v50  ;;  %v967_v27 = vsel %vm180_vm3, %v3039_v56, %v938_v43  ;;  %v3357_v33 = vrot.slane %v3222_v38, %v2150_v25  ;;  %v1059_v61 = vsel %vm244_vm4, %v2605_v51, %v2609_v53  ;;  %v1060_v18 = vsel %vm244_vm4, %v2607_v52, %v2611_v54 }
 0x28a   :  { %1666 = vmatprep.subr.bf16.mxu0 %v914_v2  ;;  %1751 = vmatpush1.bf16.msra.mxu1 %v3878_v29  ;;  %v913_v22 = vpack.c.bf16 %v905_v46, %v901_v40  ;;  %v940_v57 = vpop.permute.xlu0 %939  ;;  %v916_v16 = vpack.c.bf16 %v908_v39, %v904_v28  ;;  %v915_v30 = vpack.c.bf16 %v907_v59, %v903_v15  ;;  %v3881_v2 = vld [vmem:[#allocation77_spill] sm:$0xff]  ;;  %v3884_v28 = vld [vmem:[#allocation64_spill] sm:$0xff] }
 0x28b   :  { %v968_v14 = vsel %vm180_vm3, %v3044_v62, %v940_v57  ;;  %v1004_v38 = vmul.f32 %v3160_v24, %v967_v27  ;;  %v964_v45 = vsel %vm180_vm3, %v940_v57, %v3048_v23  ;;  %v1071_v52 = vsel %vm244_vm4, %v2609_v53, %v2597_v47 }
 0x28c   :  { %v1008_v36 = vmul.f32 %v3160_v24, %v968_v14  ;;  %1752 = vmatprep.subr.bf16.mxu1 %v916_v16  ;;  %v954_v51 = vpop.permute.xlu1 %953  ;;  %v1100_v24 = vmul.f32 %v3357_v33, %v1059_v61  ;;  %v1072_v41 = vsel %vm244_vm4, %v2611_v54, %v2599_v48  ;;  %v963_v47 = vsel %vm180_vm3, %v938_v43, %v3046_v8  ;;  %v3885_v43 = vld [vmem:[#allocation63_spill] sm:$0xff] }
 0x28d   :  { %1667 = vmatpush1.bf16.msra.mxu0 %v913_v22  ;;  %v959_v31 = vsel %vm180_vm3, %v3046_v8, %v954_v51  ;;  %v971_v55 = vsel %vm180_vm3, %v954_v51, %v3039_v56  ;;  %v1104_v3 = vmul.f32 %v3357_v33, %v1060_v18  ;;  %v1009_v56 = vmul.f32 %v3135_v32, %v964_v45  ;;  %v1912_v51 = vld [vmem:[%s3706_s1 + $0x28] sm:$0xff] }
 0x28e   :  { %1668 = vmatprep.subr.bf16.mxu0 %v1012_v0  ;;  %1753 = vmatpush1.bf16.msra.mxu1 %v915_v30  ;;  %v956_v53 = vpop.permute.xlu0 %955  ;;  %v1016_v60 = vpack.c.bf16 %v1008_v36, %v1004_v38  ;;  %v1003_v48 = vmul.f32 %v3192_v58, %v971_v55  ;;  %v1006_v54 = vmul.f32 %v3203_v5, %v959_v31  ;;  %v1911_v36 = vld [vmem:[%s3706_s1 + $0x8] sm:$0xff]  ;;  %v3886_v55 = vld [vmem:[#allocation59_spill] sm:$0xff] }
 0x28f   :  { %1754 = vmatprep.subr.bf16.mxu1 %v1014_v37  ;;  %v960_v0 = vsel %vm180_vm3, %v3048_v23, %v956_v53  ;;  %v972_v34 = vsel %vm180_vm3, %v956_v53, %v3044_v62  ;;  %v1103_v6 = vmul.f32 %v3295_v13, %v1064_v12  ;;  %v1005_v23 = vmul.f32 %v3135_v32, %v963_v47  ;;  %v3883_v12 = vld [vmem:[#allocation62_spill] sm:$0xff]  ;;  %v1913_v53 = vld [vmem:[%s3706_s1] sm:$0xff] }
 0x290   :  { %v1007_v8 = vmul.f32 %v3192_v58, %v972_v34  ;;  %v1010_v26 = vmul.f32 %v3203_v5, %v960_v0  ;;  %v1040_v11 = vpop.permute.xlu1 %1039  ;;  %v3882_v37 = vpack.c.bf16 %v3880_v35, %v3881_v2  ;;  %v1097_v58 = vmul.f32 %v3343_v7, %v1071_v52  ;;  %v1916_v0 = vld [vmem:[%s3706_s1 + $0x30] sm:$0xff] }
 0x291   :  { %1669 = vmatpush1.bf16.msra.mxu0 %v1011_v9  ;;  %v1069_v62 = vsel %vm244_vm4, %v3879_v4, %v1040_v11  ;;  %v1101_v5 = vmul.f32 %v3343_v7, %v1072_v41  ;;  %v1017_v59 = vpack.c.bf16 %v1009_v56, %v1005_v23  ;;  %v1114_v49 = vpack.c.bf16 %v3306_v42, %v3291_v44  ;;  %v1915_v56 = vld [vmem:[%s3706_s1 + $0x10] sm:$0xff] }
 0x292   :  { %1670 = vmatprep.subr.bf16.mxu0 %v1016_v60  ;;  %1755 = vmatpush1.bf16.msra.mxu1 %v3882_v37  ;;  %v1015_v21 = vpack.c.bf16 %v1007_v8, %v1003_v48  ;;  %v1042_v1 = vpop.permute.xlu0 %1041  ;;  %v1018_v9 = vpack.c.bf16 %v1010_v26, %v1006_v54  ;;  %v1116_v17 = vpack.c.bf16 %v1104_v3, %v1100_v24  ;;  %v3887_v24 = vld [vmem:[#allocation60_spill] sm:$0xff]  ;;  %v3888_v54 = vld [vmem:[#allocation55_spill] sm:$0xff]  ;;  %v3891_v23 = vld [vmem:[#allocation58_spill] sm:$0xff] }
 0x293   :  { %v1070_v32 = vsel %vm244_vm4, %v3883_v12, %v1042_v1  ;;  %v1106_v40 = vmul.f32 %v3255_v19, %v1069_v62  ;;  %v1066_v46 = vsel %vm244_vm4, %v1042_v1, %v3884_v28  ;;  %v1113_v42 = vpack.c.bf16 %v1101_v5, %v1097_v58  ;;  %v1914_v60 = vld [vmem:[%s3706_s1 + $0x20] sm:$0xff]  ;;  %v3892_v62 = vld [vmem:[#allocation67_spill] sm:$0xff] }
 0x294   :  { %v1110_v39 = vmul.f32 %v3255_v19, %v1070_v32  ;;  %1756 = vmatprep.subr.bf16.mxu1 %v1018_v9  ;;  %v1056_v50 = vpop.permute.xlu1 %1055  ;;  %v1065_v27 = vsel %vm244_vm4, %v1040_v11, %v3885_v43  ;;  %v1115_v22 = vpack.c.bf16 %v1103_v6, %v3353_v63  ;;  %v1111_v57 = vmul.f32 %v3295_v13, %v1066_v46  ;;  %v3889_v8 = vld [vmem:[#allocation56_spill] sm:$0xff]  ;;  %v3890_v6 = vld [vmem:[#allocation57_spill] sm:$0xff]  ;;  %v3893_v37 = vld [vmem:[#allocation51_spill] sm:$0xff] }
 0x295   :  { %1671 = vmatpush1.bf16.msra.mxu0 %v1015_v21  ;;  %v1061_v15 = vsel %vm244_vm4, %v3885_v43, %v1056_v50  ;;  %v1073_v44 = vsel %vm244_vm4, %v1056_v50, %v3879_v4  ;;  %v1107_v45 = vmul.f32 %v3295_v13, %v1065_v27  ;;  %v1130_v52 = vpack.c.bf16 %v1912_v51, %v1911_v36  ;;  %v3894_v58 = vld [vmem:[#allocation52_spill] sm:$0xff]  ;;  %v3896_v9 = vld [vmem:[#allocation66_spill] sm:$0xff] }
 0x296   :  { %1672 = vmatprep.subr.bf16.mxu0 %v1114_v49  ;;  %1757 = vmatpush1.bf16.msra.mxu1 %v1017_v59  ;;  %v1058_v29 = vpop.permute.xlu0 %1057  ;;  %v1118_v19 = vpack.c.bf16 %v1110_v39, %v1106_v40  ;;  %v1105_v18 = vmul.f32 %v3343_v7, %v1073_v44  ;;  %v1108_v30 = vmul.f32 %v3357_v33, %v1061_v15  ;;  %v3895_v21 = vld [vmem:[#allocation68_spill] sm:$0xff]  ;;  %v3898_v32 = vld [vmem:[#allocation54_spill] sm:$0xff]  ;;  %v3901_v44 = vld [vmem:[#allocation15_spill] sm:$0xff] }
 0x297   :  { %1758 = vmatprep.subr.bf16.mxu1 %v1116_v17  ;;  %v1062_v16 = vsel %vm244_vm4, %v3884_v28, %v1058_v29  ;;  %v1074_v61 = vsel %vm244_vm4, %v1058_v29, %v3883_v12  ;;  %v1132_v41 = vpack.c.bf16 %v3887_v24, %v3886_v55  ;;  %v1119_v47 = vpack.c.bf16 %v1111_v57, %v1107_v45  ;;  %v3897_v12 = vld [vmem:[#allocation53_spill] sm:$0xff]  ;;  %v3904_v29 = vld [vmem:[#allocation4_spill] sm:$0xff]  ;;  %v3908_v45 = vld [vmem:[#allocation7_spill] sm:$0xff] }
 0x298   :  { %v1109_v14 = vmul.f32 %v3343_v7, %v1074_v61  ;;  %v1112_v38 = vmul.f32 %v3357_v33, %v1062_v16  ;;  %v3449_v63 = vpop.permute.xlu1 %1475  ;;  %v1129_v3 = vpack.c.bf16 %v1914_v60, %v1913_v53  ;;  %v1131_v34 = vpack.c.bf16 %v1916_v0, %v1915_v56  ;;  %v3899_v17 = vld [vmem:[#allocation65_spill] sm:$0xff]  ;;  %v3906_v16 = vld [vmem:[#allocation11_spill] sm:$0xff]  ;;  %v3909_v51 = vld [vmem:[#allocation8_spill] sm:$0xff] }
 0x299   :  { %1673 = vmatpush1.bf16.msra.mxu0 %v1113_v42  ;;  %v1134_v26 = vpack.c.bf16 %v3889_v8, %v3888_v54  ;;  %v1136_v4 = vpack.c.bf16 %v3891_v23, %v3890_v6  ;;  %v1133_v5 = vpack.c.bf16 %v3894_v58, %v3893_v37  ;;  %v1135_v49 = vpack.c.bf16 %v3898_v32, %v3897_v12  ;;  %v3900_v28 = vld [vmem:[#allocation9_spill] sm:$0xff]  ;;  %v3902_v42 = vld [vmem:[#allocation14_spill] sm:$0xff]  ;;  %v3914_v60 = vld [vmem:[#allocation12_spill] sm:$0xff] }
 0x29a   :  { %1674 = vmatprep.subr.bf16.mxu0 %v1118_v19  ;;  %1759 = vmatpush1.bf16.msra.mxu1 %v1115_v22  ;;  %v1117_v31 = vpack.c.bf16 %v1109_v14, %v1105_v18  ;;  %v3458_v7 = vpop.permute.xlu0 %1477  ;;  %v1120_v33 = vpack.c.bf16 %v1112_v38, %v1108_v30  ;;  %v3903_v27 = vpack.c.bf16 %v3901_v44, %v3902_v42  ;;  %v3905_v57 = vld [vmem:[#allocation13_spill] sm:$0xff]  ;;  %v3910_v24 = vld [vmem:[#allocation6_spill] sm:$0xff]  ;;  %v3924_v12 = vld [vmem:[#allocation16_spill] sm:$0xff] }
 0x29b   :  { %v3907_v61 = vpack.c.bf16 %v3905_v57, %v3906_v16  ;;  %v3918_v6 = vld [vmem:[#allocation70_spill] sm:$0xff]  ;;  %v3929_v42 = vld [vmem:[#allocation20_spill] sm:$0xff]  ;;  %v3931_v16 = vld [vmem:[#allocation17_spill] sm:$0xff] }
 0x29c   :  { %1760 = vmatprep.subr.bf16.mxu1 %v1120_v33  ;;  %v1158_v13 = vpop.permute.xlu1 %1157  ;;  %v3930_v57 = vld [vmem:[#allocation18_spill] sm:$0xff] }
 0x29d   :  { %1675 = vmatpush1.bf16.msra.mxu0 %v1117_v31  ;;  %v1183_v35 = vsel %vm316_vm5, %v1158_v13, %v3892_v62  ;;  %v1187_v40 = vsel %vm316_vm5, %v3899_v17, %v1158_v13  ;;  %v3913_v13 = vld [vmem:[#allocation71_spill] sm:$0xff] }
 0x29e   :  { %1761 = vmatpush1.bf16.msra.mxu1 %v1119_v47  ;;  %1676 = vmatprep.subr.bf16.mxu0 %v1130_v52  ;;  %v3474_v48 = vpop.permute.xlu0 %1457  ;;  %v1224_v46 = vmul.f32 %v3900_v28, %v1183_v35  ;;  %v1223_v30 = vmul.f32 %v3904_v29, %v1187_v40  ;;  %v3920_v35 = vld [vmem:[#allocation21_spill] sm:$0xff]  ;;  %v3926_v40 = vld [vmem:[#allocation23_spill] sm:$0xff] }
 0x29f   :  { %1762 = vmatprep.subr.bf16.mxu1 %v1132_v41  ;;  %v3911_v41 = vld [vmem:[#allocation5_spill] sm:$0xff] }
 0x2a0   :  { %v1174_v11 = vpop.permute.xlu1 %1173  ;;  %v3912_v47 = vpack.c.bf16 %v3910_v24, %v3911_v41  ;;  %v3938_v24 = vld [vmem:[#allocation76_spill] sm:$0xff] }
 0x2a1   :  { %1677 = vmatpush1.bf16.msra.mxu0 %v1129_v3  ;;  %v1179_v43 = vsel %vm316_vm5, %v3892_v62, %v1174_v11  ;;  %v1191_v15 = vsel %vm316_vm5, %v1174_v11, %v3899_v17  ;;  %v3915_v3 = vld [vmem:[#allocation10_spill] sm:$0xff]  ;;  %v3925_v17 = vld [vmem:[#allocation25_spill] sm:$0xff] }
 0x2a2   :  { %1678 = vmatprep.subr.bf16.mxu0 %v1134_v26  ;;  %1763 = vmatpush1.bf16.msra.mxu1 %v1131_v34  ;;  %v1160_v2 = vpop.permute.xlu0 %1159  ;;  %v1225_v36 = vmul.f32 %v3908_v45, %v1179_v43  ;;  %v1226_v52 = vmul.f32 %v3909_v51, %v1191_v15  ;;  %v3916_v56 = vpack.c.bf16 %v3914_v60, %v3915_v3  ;;  %v3917_v26 = vld [vmem:[#allocation72_spill] sm:$0xff]  ;;  %v3928_v15 = vld [vmem:[#allocation19_spill] sm:$0xff]  ;;  %v3941_v3 = vld [vmem:[#allocation33_spill] sm:$0xff] }
 0x2a3   :  { %1764 = vmatprep.subr.bf16.mxu1 %v1136_v4  ;;  %v1184_v1 = vsel %vm316_vm5, %v1160_v2, %v3895_v21  ;;  %v1188_v59 = vsel %vm316_vm5, %v3896_v9, %v1160_v2  ;;  %v3919_v4 = vld [vmem:[#allocation69_spill] sm:$0xff] }
 0x2a4   :  { %v1228_v39 = vmul.f32 %v3900_v28, %v1184_v1  ;;  %v1260_v50 = vpop.permute.xlu1 %1259  ;;  %v1227_v19 = vmul.f32 %v3904_v29, %v1188_v59  ;;  %v3921_v1 = vld [vmem:[#allocation27_spill] sm:$0xff]  ;;  %v3927_v28 = vpack.c.bf16 %v3925_v17, %v3926_v40 }
 0x2a5   :  { %1679 = vmatpush1.bf16.msra.mxu0 %v1133_v5  ;;  %v1285_v53 = vsel %vm380_vm6, %v1260_v50, %v3913_v13  ;;  %v1289_v62 = vsel %vm380_vm6, %v3919_v4, %v1260_v50  ;;  %v3952_v17 = vld [vmem:[#allocation31_spill] sm:$0xff] }
 0x2a6   :  { %1680 = vmatprep.subr.bf16.mxu0 %v3903_v27  ;;  %1765 = vmatpush1.bf16.msra.mxu1 %v1135_v49  ;;  %v1176_v22 = vpop.permute.xlu0 %1175  ;;  %v1236_v18 = vpack.c.bf16 %v1228_v39, %v1224_v46  ;;  %v1235_v0 = vpack.c.bf16 %v1227_v19, %v1223_v30  ;;  %v1326_v2 = vmul.f32 %v3920_v35, %v1285_v53  ;;  %v3940_v53 = vld [vmem:[#allocation73_spill] sm:$0xff] }
 0x2a7   :  { %1766 = vmatprep.subr.bf16.mxu1 %v3907_v61  ;;  %v1180_v14 = vsel %vm316_vm5, %v3895_v21, %v1176_v22  ;;  %v1192_v38 = vsel %vm316_vm5, %v1176_v22, %v3896_v9  ;;  %v3922_v9 = vld [vmem:[#allocation26_spill] sm:$0xff]  ;;  %v1325_v39 = vmul.f32 %v3924_v12, %v1289_v62  ;;  %v3932_v61 = vpack.c.bf16 %v3930_v57, %v3931_v16  ;;  %v3946_v62 = vld [vmem:[#allocation40_spill] sm:$0xff] }
 0x2a8   :  { %v1229_v31 = vmul.f32 %v3908_v45, %v1180_v14  ;;  %v1230_v33 = vmul.f32 %v3909_v51, %v1192_v38  ;;  %v1276_v55 = vpop.permute.xlu1 %1275  ;;  %v3923_v59 = vpack.c.bf16 %v3921_v1, %v3922_v9  ;;  %v3934_v14 = vld [vmem:[#allocation24_spill] sm:$0xff]  ;;  %v3935_v38 = vld [vmem:[#allocation22_spill] sm:$0xff]  ;;  %v3950_v1 = vld [vmem:[#allocation35_spill] sm:$0xff] }
 0x2a9   :  { %1681 = vmatpush1.bf16.msra.mxu0 %v3912_v47  ;;  %v1281_v5 = vsel %vm380_vm6, %v3913_v13, %v1276_v55  ;;  %v1293_v21 = vsel %vm380_vm6, %v1276_v55, %v3919_v4  ;;  %v3936_v45 = vpack.c.bf16 %v3934_v14, %v3935_v38  ;;  %v3939_v47 = vld [vmem:[#allocation74_spill] sm:$0xff] }
 0x2aa   :  { %1682 = vmatprep.subr.bf16.mxu0 %v1236_v18  ;;  %1767 = vmatpush1.bf16.msra.mxu1 %v3916_v56  ;;  %v1237_v34 = vpack.c.bf16 %v1229_v31, %v1225_v36  ;;  %v1262_v54 = vpop.permute.xlu0 %1261  ;;  %v1238_v8 = vpack.c.bf16 %v1230_v33, %v1226_v52  ;;  %v1327_v44 = vmul.f32 %v3928_v15, %v1281_v5  ;;  %v3933_v18 = vld [vmem:[#allocation75_spill] sm:$0xff]  ;;  %v3937_v33 = vld [vmem:[#allocation41_spill] sm:$0xff]  ;;  %v3959_v57 = vld [vmem:[#allocation34_spill] sm:$0xff] }
 0x2ab   :  { %v1286_v11 = vsel %vm380_vm6, %v1262_v54, %v3917_v26  ;;  %v1290_v23 = vsel %vm380_vm6, %v3918_v6, %v1262_v54  ;;  %v1328_v27 = vmul.f32 %v3929_v42, %v1293_v21  ;;  %v1496_v55 = vsel %vm508_vm8, %v3458_v7, %v3937_v33  ;;  %v3942_v54 = vld [vmem:[#allocation42_spill] sm:$0xff]  ;;  %v3949_v21 = vld [vmem:[#allocation37_spill] sm:$0xff] }
 0x2ac   :  { %v1330_v37 = vmul.f32 %v3920_v35, %v1286_v11  ;;  %1768 = vmatprep.subr.bf16.mxu1 %v1238_v8  ;;  %v1362_v58 = vpop.permute.xlu1 %1361  ;;  %v1329_v32 = vmul.f32 %v3924_v12, %v1290_v23  ;;  %v3592_v8 = vrot.slane %v3942_v54, %v2150_v25  ;;  %v3944_v23 = vld [vmem:[#allocation38_spill] sm:$0xff]  ;;  %v1495_v35 = vsel %vm508_vm8, %v3449_v63, %v3946_v62  ;;  %v3947_v25 = vld [vmem:[#allocation48_spill] sm:$0xff] }
 0x2ad   :  { %1683 = vmatpush1.bf16.msra.mxu0 %v1235_v0  ;;  %v1387_v30 = vsel %vm444_vm7, %v1362_v58, %v3933_v18  ;;  %v1391_v60 = vsel %vm444_vm7, %v3940_v53, %v1362_v58  ;;  %v3951_v9 = vpack.c.bf16 %v3949_v21, %v3950_v1  ;;  %v3961_v33 = vld [vmem:[#allocation50_spill] sm:$0xff] }
 0x2ae   :  { %1684 = vmatprep.subr.bf16.mxu0 %v3923_v59  ;;  %1769 = vmatpush1.bf16.msra.mxu1 %v1237_v34  ;;  %v1278_v49 = vpop.permute.xlu0 %1277  ;;  %v1338_v46 = vpack.c.bf16 %v1330_v37, %v1326_v2  ;;  %v1337_v36 = vpack.c.bf16 %v1329_v32, %v1325_v39  ;;  %v1428_v56 = vmul.f32 %v3941_v3, %v1387_v30  ;;  %v3948_v37 = vld [vmem:[#allocation28_spill] sm:$0xff] }
 0x2af   :  { %1770 = vmatprep.subr.bf16.mxu1 %v3927_v28  ;;  %v1282_v50 = vsel %vm380_vm6, %v3917_v26, %v1278_v49  ;;  %v1294_v43 = vsel %vm380_vm6, %v1278_v49, %v3918_v6  ;;  %v3943_v6 = vld [vmem:[#allocation39_spill] sm:$0xff]  ;;  %v1484_v2 = vsel %vm508_vm8, %v3947_v25, %v3458_v7  ;;  %v1528_v12 = vmul.f32 %v3592_v8, %v1496_v55  ;;  %v3953_v28 = vld [vmem:[#allocation32_spill] sm:$0xff]  ;;  %v3962_v55 = vld [vmem:[#allocation49_spill] sm:$0xff] }
 0x2b0   :  { %v1331_v29 = vmul.f32 %v3928_v15, %v1282_v50  ;;  %v1332_v19 = vmul.f32 %v3929_v42, %v1294_v43  ;;  %v1378_v22 = vpop.permute.xlu1 %1377  ;;  %v3945_v4 = vpack.c.bf16 %v3943_v6, %v3944_v23  ;;  %v1427_v32 = vmul.f32 %v3948_v37, %v1391_v60  ;;  %v3954_v15 = vld [vmem:[#allocation30_spill] sm:$0xff]  ;;  %v3967_v6 = vld [vmem:[#allocation44_spill] sm:$0xff] }
 0x2b1   :  { %1685 = vmatpush1.bf16.msra.mxu0 %v3932_v61  ;;  %v1383_v26 = vsel %vm444_vm7, %v3933_v18, %v1378_v22  ;;  %v1395_v11 = vsel %vm444_vm7, %v1378_v22, %v3940_v53  ;;  %v3958_v22 = vld [vmem:[#allocation36_spill] sm:$0xff]  ;;  %v1524_v61 = vmul.f32 %v3592_v8, %v1495_v35  ;;  %v3964_v53 = vld [vmem:[#allocation43_spill] sm:$0xff]  ;;  %v3969_v25 = vmov 0  }
 0x2b2   :  { %1686 = vmatprep.subr.bf16.mxu0 %v1338_v46  ;;  %1771 = vmatpush1.bf16.msra.mxu1 %v3936_v45  ;;  %v1339_v51 = vpack.c.bf16 %v1331_v29, %v1327_v44  ;;  %v1364_v52 = vpop.permute.xlu0 %1363  ;;  %v1340_v31 = vpack.c.bf16 %v1332_v19, %v1328_v27  ;;  %v1429_v40 = vmul.f32 %v3952_v17, %v1383_v26  ;;  %v3955_v44 = vld [vmem:[#allocation29_spill] sm:$0xff]  ;;  %v3957_v29 = vld [vmem:[#allocation47_spill] sm:$0xff] }
 0x2b3   :  { %v1388_v41 = vsel %vm444_vm7, %v1364_v52, %v3938_v24  ;;  %v1392_v13 = vsel %vm444_vm7, %v3939_v47, %v1364_v52  ;;  %v1430_v46 = vmul.f32 %v3953_v28, %v1395_v11  ;;  %v3956_v42 = vpack.c.bf16 %v3954_v15, %v3955_v44  ;;  %v3966_v11 = vld [vmem:[#allocation45_spill] sm:$0xff] }
 0x2b4   :  { %v1432_v0 = vmul.f32 %v3941_v3, %v1388_v41  ;;  %1772 = vmatprep.subr.bf16.mxu1 %v1340_v31  ;;  %v1456_v34 = vpop.permute.xlu1 %1455  ;;  %v1431_v58 = vmul.f32 %v3948_v37, %v1392_v13  ;;  %v1512_v27 = vrot.slane %v3942_v54, %v2140_v20  ;;  %v1483_v19 = vsel %vm508_vm8, %v3957_v29, %v3449_v63  ;;  %v1905_v20 = vld [vmem:[%s3707_s5] ss:$12 sps:$4 sm:$0xff]  }
 0x2b5   :  { %1687 = vmatpush1.bf16.msra.mxu0 %v1337_v36  ;;  %v3960_v16 = vpack.c.bf16 %v3958_v22, %v3959_v57  ;;  %v3968_v23 = vpack.c.bf16 %v3966_v11, %v3967_v6 }
 0x2b6   :  { %1688 = vmatprep.subr.bf16.mxu0 %v3945_v4  ;;  %1773 = vmatpush1.bf16.msra.mxu1 %v1339_v51  ;;  %v1380_v5 = vpop.permute.xlu0 %1379  ;;  %v1440_v59 = vpack.c.bf16 %v1432_v0, %v1428_v56  ;;  %v1439_v18 = vpack.c.bf16 %v1431_v58, %v1427_v32  ;;  %v1527_v45 = vmul.f32 %v1512_v27, %v1484_v2  ;;  %v3965_v56 = vld [vmem:[#allocation46_spill] sm:$0xff] }
 0x2b7   :  { %1774 = vmatprep.subr.bf16.mxu1 %v3951_v9  ;;  %v1384_v49 = vsel %vm444_vm7, %v3938_v24, %v1380_v5  ;;  %v1396_v7 = vsel %vm444_vm7, %v1380_v5, %v3939_v47  ;;  %v1540_v51 = vpack.c.bf16 %v1528_v12, %v1524_v61  ;;  %v1523_v52 = vmul.f32 %v1512_v27, %v1483_v19 }
 0x2b8   :  { %v1433_v39 = vmul.f32 %v3952_v17, %v1384_v49  ;;  %v1434_v50 = vmul.f32 %v3953_v28, %v1396_v7  ;;  %v1464_v43 = vpop.permute.xlu1 %1463  ;;  %v3963_v24 = vpack.c.bf16 %v3961_v33, %v3962_v55  ;;  %v1908_v49 = vld [vmem:[%s3707_s5 + $0x8] ss:$12 sps:$4 sm:$0xff]  }
 0x2b9   :  { %1689 = vmatpush1.bf16.msra.mxu0 %v3956_v42  ;;  %v1493_v41 = vsel %vm508_vm8, %v1456_v34, %v1464_v43  ;;  %v1539_v13 = vpack.c.bf16 %v1527_v45, %v1523_v52 }
 0x2ba   :  { %1690 = vmatprep.subr.bf16.mxu0 %v1440_v59  ;;  %1775 = vmatpush1.bf16.msra.mxu1 %v3960_v16  ;;  %v1441_v30 = vpack.c.bf16 %v1433_v39, %v1429_v40  ;;  %v1466_v14 = vpop.permute.xlu0 %1465  ;;  %v1442_v38 = vpack.c.bf16 %v1434_v50, %v1430_v46  ;;  %v1529_v4 = vmul.f32 %v3964_v53, %v1493_v41 }
 0x2bb   :  { %v1494_v63 = vsel %vm508_vm8, %v3474_v48, %v1466_v14 }
 0x2bc   :  { %1776 = vmatprep.subr.bf16.mxu1 %v1442_v38  ;;  %v1472_v36 = vpop.permute.xlu1 %1471  ;;  %v1533_v60 = vmul.f32 %v3964_v53, %v1494_v63 }
 0x2bd   :  { %1691 = vmatpush1.bf16.msra.mxu0 %v1439_v18  ;;  %v1489_v31 = vsel %vm508_vm8, %v1464_v43, %v1472_v36 }
 0x2be   :  { %1703 = vmatprep.subr.bf16.mxu0 %v3963_v24  ;;  %1777 = vmatpush1.bf16.msra.mxu1 %v1441_v30  ;;  %v1474_v47 = vpop.permute.xlu0 %1473  ;;  %v1530_v0 = vmul.f32 %v3965_v56, %v1489_v31  ;;  %v1541_v58 = vpack.c.bf16 %v1533_v60, %v1529_v4 }
 0x2bf   :  { %1789 = vmatprep.subr.bf16.mxu1 %v1540_v51  ;;  %v1490_v3 = vsel %vm508_vm8, %v1466_v14, %v1474_v47 }
 0x2c0   :  { %1693 = vmatmul.mubr.bf16.vlgmr.msra.gmra.mrb[4].mxu0 %v1905_v20  ;;  %v1534_v54 = vmul.f32 %v3965_v56, %v1490_v3  ;;  %v1480_v26 = vpop.permute.xlu1 %1479 }
 0x2c1   :  { %1779 = vmatmul.mubr.bf16.vlgmr.msra.gmra.mrb[4].mxu1 %v1905_v20  ;;  %1704 = vmatpush1.bf16.msra.mxu0 %v3968_v23  ;;  %v1485_v62 = vsel %vm508_vm8, %v1472_v36, %v1480_v26  ;;  %v1497_v35 = vsel %vm508_vm8, %v1480_v26, %v1456_v34 }
 0x2c2   :  { %1790 = vmatpush1.bf16.msra.mxu1 %v1539_v13  ;;  %1735 = vmatprep.mubr.bf16.mxu0 %v3969_v25  ;;  %v1482_v2 = vpop.permute.xlu0 %1481  ;;  %v1542_v37 = vpack.c.bf16 %v1534_v54, %v1530_v0  ;;  %v1531_v1 = vmul.f32 %v1512_v27, %v1485_v62  ;;  %v1532_v9 = vmul.f32 %v3592_v8, %v1497_v35 }
 0x2c3   :  { %1821 = vmatprep.mubr.bf16.mxu1 %v3969_v25  ;;  %v1486_v5 = vsel %vm508_vm8, %v1474_v47, %v1482_v2  ;;  %v1498_v21 = vsel %vm508_vm8, %v1482_v2, %v3474_v48 }
 0x2c4   :  { %v1535_v59 = vmul.f32 %v1512_v27, %v1486_v5  ;;  %v1536_v34 = vmul.f32 %v3592_v8, %v1498_v21  ;;  %1705 = vmatprep.subr.bf16.mxu0 %v1542_v37 }
 0x2c5   :  { %1706 = vmatpush1.bf16.msra.mxu0 %v1541_v58 }
 0x2c6   :  { %v1543_v12 = vpack.c.bf16 %v1535_v59, %v1531_v1  ;;  %v1544_v32 = vpack.c.bf16 %v1536_v34, %v1532_v9 }
 0x2c8   :  { %1791 = vmatprep.subr.bf16.mxu1 %v1544_v32 }
 0x2c9   :  { %1792 = vmatpush1.bf16.msra.mxu1 %v1543_v12 }
 0x2cc   :  { %1873 = vmatmul.mubr.msk.bf16.vlgmr.msra.gmra.mrb[4].mxu0 %vm1656_vm9, %v1908_v49 }
 0x2cd   :  { %1874 = vmatmul.mubr.msk.bf16.vlgmr.msra.gmra.mrb[4].mxu1 %vm1656_vm9, %v1908_v49 }
 0x2d1   :  { %v1634_v10 = vpop.permute.xlu1 %1633 }
 0x2d3   :  { %v1639_v48 = vpop.permute.xlu0 %1638 }
 0x39f   :  { %v1737_v7 = vpop.f32.mrb[4].mxu0 }
 0x3a0   :  { %v1875_v17 = vadd.f32 %v1737_v7, %v1634_v10  ;;  %v1739_v40 = vpop.f32.mrb[5].mxu0  ;;  %v1823_v28 = vpop.f32.mrb[4].mxu1 }
 0x3a1   :  { %v1876_v8 = vadd.f32 %v1739_v40, %v1634_v10  ;;  %v1879_v46 = vadd.f32 %v1823_v28, %v1634_v10  ;;  %v1741_v39 = vpop.f32.mrb[6].mxu0  ;;  %v1825_v50 = vpop.f32.mrb[5].mxu1 }
 0x3a2   :  { %v1832_v43 = vmax.f32 %v1875_v17, 0.0  ;;  %v1877_v15 = vadd.f32 %v1741_v39, %v1639_v48  ;;  %v1880_v44 = vadd.f32 %v1825_v50, %v1634_v10  ;;  %v1743_v42 = vpop.f32.mrb[7].mxu0  ;;  %v1827_v27 = vpop.f32.mrb[6].mxu1 }
 0x3a3   :  { %v1833_v29 = vmax.f32 %v1876_v8, 0.0  ;;  %v1834_v19 = vmax.f32 %v1879_v46, 0.0  ;;  %v1878_v22 = vadd.f32 %v1743_v42, %v1639_v48  ;;  %v1881_v57 = vadd.f32 %v1827_v27, %v1639_v48  ;;  %v1829_v16 = vpop.f32.mrb[7].mxu1 }
 0x3a4   :  { %1840 = vst [vmem:[%s3709_s7] sm:$0xff] %v1832_v43  ;;  %v1836_v61 = vmax.f32 %v1877_v15, 0.0  ;;  %v1835_v18 = vmax.f32 %v1880_v44, 0.0  ;;  %v1882_v30 = vadd.f32 %v1829_v16, %v1639_v48 }
 0x3a5   :  { %1841 = vst [vmem:[%s3709_s7 + $0x8] sm:$0xff] %v1833_v29  ;;  %1842 = vst [vmem:[%s3709_s7 + $0x10] sm:$0xff] %v1834_v19  ;;  %v1837_v14 = vmax.f32 %v1878_v22, 0.0  ;;  %v1838_v38 = vmax.f32 %v1881_v57, 0.0 }
 0x3a6   :  { %1844 = vst [vmem:[%s3709_s7 + $0x20] sm:$0xff] %v1836_v61  ;;  %1843 = vst [vmem:[%s3709_s7 + $0x18] sm:$0xff] %v1835_v18  ;;  %v1839_v45 = vmax.f32 %v1882_v30, 0.0 }
 0x3a7   :  { %1845 = vst [vmem:[%s3709_s7 + $0x28] sm:$0xff] %v1837_v14  ;;  %1846 = vst [vmem:[%s3709_s7 + $0x30] sm:$0xff] %v1838_v38 }
 0x3a8   :  { %1847 = vst [vmem:[%s3709_s7 + $0x38] sm:$0xff] %v1839_v45 }

</bundles_post_ra>
